<compile_context>
chip_gen: v7x
topology: tpu7x:2x2x1
jax: 0.10.0
libtpu: 0.0.40
codegen_flags: <defaults>
</compile_context>

<pallas_src>
import functools

import numpy as np

import jax
import jax.numpy as jnp
from jax.experimental import pallas as pl
from jax.experimental.pallas import tpu as pltpu


def round_up(x: int, m: int) -> int:
    return (x + m - 1) // m * m


# ----------------------------------------------------------------------------
# Pallas kernels
# ----------------------------------------------------------------------------
def propagate_layer_kernel(counts_ref, kidx_ref,               # scalar prefetch (SMEM)
                           a_ref, dsqrt_ref, y_ref, sum_ref,   # inputs  (VMEM)
                           y_out_ref, sum_out_ref,             # outputs (VMEM)
                           acc_ref,                            # f32 scratch
                           *, tk: int, out_scale: float):
    """One LightGCN layer on row-block i.

    The propagated state is Y_l = D^{-1/2} E_l so the stored adjacency is an
    exact 0/1 int8 matrix:
        acc     = A[i, :] @ Y_l            (int8 -> bf16 cast, f32 accumulate)
        E_{l+1} = d^{-1/2}[i] * acc
        sum_out = (sum_in + E_{l+1}) * out_scale     (out_scale folds the mean
                                                      on the last layer only)
        Y_{l+1} = d^{-1/2}[i] * E_{l+1}
    grid = (row_blocks, max_nnz_k_blocks); the k axis only visits the column
    blocks listed in the per-row sparsity table, padded iterations
    (j >= counts[i]) reuse the previous A block (no fresh DMA) and skip MXU.
    """
    i = pl.program_id(0)
    j = pl.program_id(1)

    @pl.when(j == 0)
    def _init():
        acc_ref[...] = jnp.zeros_like(acc_ref)

    @pl.when(j < counts_ref[i])
    def _accumulate():
        start = pl.multiple_of(kidx_ref[i, j] * tk, tk)
        y_blk = y_ref[pl.ds(start, tk), :]                  # VMEM-resident Y slice
        a_blk = a_ref[...].astype(jnp.float32).astype(jnp.bfloat16)  # exact 0/1
        acc_ref[...] += jnp.dot(a_blk, y_blk,
                                preferred_element_type=jnp.float32)

    @pl.when(j == pl.num_programs(1) - 1)
    def _finalize():
        s = dsqrt_ref[...]                        # (tm, 1) f32 rows of d^{-1/2}
        e_new = s * acc_ref[...]                  # E_{l+1} for this row block
        new_sum = sum_ref[...] + e_new
        if out_scale != 1.0:                      # last layer: fold the mean
            new_sum = new_sum * out_scale
        sum_out_ref[...] = new_sum                # f32 running sum (aliased)
        y_out_ref[...] = (s * e_new).astype(y_out_ref.dtype)   # bf16 Y_{l+1}


def score_kernel(u_ref, i_ref, out_ref):
    """(user_emb * item_emb).sum over hidden.  Operands are (H_pad, tb) so the
    reduction is over the sublane axis and the (1, tb) output is lane-dense."""
    out_ref[...] = jnp.sum(u_ref[...] * i_ref[...], axis=0, keepdims=True)


# ----------------------------------------------------------------------------
# Wrappers
# ----------------------------------------------------------------------------
def _vmem_limit_bytes(tm: int, tk: int, n_pad: int, h_pad: int) -> int:
    """Derive the scoped-VMEM limit from the real buffer footprint, clamped to
    75% of this generation's physical VMEM (64 MiB on v7x, 128 MiB v5e/v6e)."""
    need = (2 * tm * tk * 1            # int8 A tiles (double buffered)
            + 2 * n_pad * h_pad * 2    # resident bf16 Y (double buffered)
            + 2 * tm * 128 * 4         # d^{-1/2} blocks (lane padded)
            + 2 * tm * h_pad * 4       # f32 sum in
            + 2 * tm * h_pad * 2       # bf16 Y out
            + 2 * tm * h_pad * 4       # f32 sum out
            + tm * h_pad * 4)          # f32 accumulator scratch
    try:
        cap = pltpu.get_tpu_info().vmem_capacity_bytes
    except Exception:                  # conservative default: v7x (64 MiB)
        cap = 64 * 1024 * 1024
    return int(min(max(2 * need, 32 * 1024 * 1024), cap * 3 // 4))


def lightgcn_propagate(adj_int8, dsqrt_col, all_emb_f32, blk_counts, blk_kidx,
                       n_layers: int, *, tm: int, tk: int):
    """adj_int8: (N_pad, N_pad) exact 0/1 int8; dsqrt_col: (N_pad, 1) f32
    d^{-1/2}; all_emb_f32: (N_pad, H_pad) f32 E_0.
    Returns (N_pad, H_pad) f32 mean over [E_0, G E_0, ..., G^L E_0]."""
    N_pad, H_pad = all_emb_f32.shape
    ni = N_pad // tm
    max_nnz = blk_kidx.shape[1]

    # TODO(synk): Y is assumed VMEM-resident (2 * N_pad * H_pad * 2 bytes); for
    # graphs too large for that, fall back to a per-k-block Y BlockSpec.

    def build(out_scale: float):
        kernel = functools.partial(propagate_layer_kernel, tk=tk,
                                   out_scale=out_scale)
        grid_spec = pltpu.PrefetchScalarGridSpec(
            num_scalar_prefetch=2,
            grid=(ni, max_nnz),
            in_specs=[
                # A tile: row-block i, column block from the sparsity table.
                pl.BlockSpec((tm, tk), lambda i, j, cnt, kx: (i, kx[i, j])),
                # d^{-1/2} rows for row-block i.
                pl.BlockSpec((tm, 1), lambda i, j, cnt, kx: (i, 0)),
                # Y_l fully VMEM-resident; k-block sliced inside the kernel.
                pl.BlockSpec((N_pad, H_pad), lambda i, j, cnt, kx: (0, 0)),
                # running layer sum for row-block i.
                pl.BlockSpec((tm, H_pad), lambda i, j, cnt, kx: (i, 0)),
            ],
            out_specs=[
                pl.BlockSpec((tm, H_pad), lambda i, j, cnt, kx: (i, 0)),  # Y_{l+1}
                pl.BlockSpec((tm, H_pad), lambda i, j, cnt, kx: (i, 0)),  # sum
            ],
            scratch_shapes=[pltpu.VMEM((tm, H_pad), jnp.float32)],
        )
        return pl.pallas_call(
            kernel,
            grid_spec=grid_spec,
            out_shape=(
                jax.ShapeDtypeStruct((N_pad, H_pad), jnp.bfloat16),
                jax.ShapeDtypeStruct((N_pad, H_pad), jnp.float32),
            ),
            # Inputs are (counts, kidx, A, dsqrt, Y, sum) -> sum is index 5
            # (the alias index counts the two scalar-prefetch operands).
            input_output_aliases={5: 1},
            compiler_params=pltpu.CompilerParams(
                # TODO(synk): on v7x, if the profile shows only one TensorCore
                # busy, switch the row axis to pltpu.CORE_PARALLEL.
                dimension_semantics=("parallel", "arbitrary"),
                vmem_limit_bytes=_vmem_limit_bytes(tm, tk, N_pad, H_pad),
            ),
        )

    # Y_0 = D^{-1/2} E_0 (bf16, propagated state); layer sum starts at E_0 (f32).
    y = (all_emb_f32 * dsqrt_col).astype(jnp.bfloat16)
    layer_sum = all_emb_f32
    if n_layers == 0:
        return layer_sum

    mid_call = build(1.0)
    last_call = build(1.0 / float(n_layers + 1))
    # TODO(synk): for power-law degree graphs, flatten to a CSR-style grid over
    # actual nonzero blocks to avoid paying ~0.35 us per padded (j>=counts[i])
    # grid step; the synthetic test graph is nearly uniform so it is moot here.
    for layer in range(n_layers):
        call = last_call if layer == n_layers - 1 else mid_call
        y, layer_sum = call(blk_counts, blk_kidx, adj_int8, dsqrt_col,
                            y, layer_sum)
    return layer_sum


def lightgcn_score(user_emb_t, item_emb_t, *, tb: int = 128):
    """user_emb_t, item_emb_t: (H_pad, B_pad) f32 -> (1, B_pad) f32 scores."""
    H_pad, B_pad = user_emb_t.shape
    return pl.pallas_call(
        score_kernel,
        out_shape=jax.ShapeDtypeStruct((1, B_pad), jnp.float32),
        grid=(B_pad // tb,),
        in_specs=[pl.BlockSpec((H_pad, tb), lambda b: (0, b)),
                  pl.BlockSpec((H_pad, tb), lambda b: (0, b))],
        out_specs=pl.BlockSpec((1, tb), lambda b: (0, b)),
        compiler_params=pltpu.CompilerParams(
            dimension_semantics=("parallel",)),
    )(user_emb_t, item_emb_t)


class LightGCNPallas:
    """Synthetic LightGCN with deterministic parameters (eval mode, no dropout)."""

    def __init__(self, n_user: int, n_item: int, hidden: int, n_layers: int,
                 key: jax.Array, *, tm: int = 256, tk: int = 256):
        self.n_user = n_user
        self.n_item = n_item
        self.hidden = hidden
        self.n_layers = n_layers
        self.tm, self.tk = tm, tk

        k_u, k_i = jax.random.split(key)
        # nn.init.normal_(weight, std=0.1)
        self.embedding_user = 0.1 * jax.random.normal(
            k_u, (n_user, hidden), dtype=jnp.float32)
        self.embedding_item = 0.1 * jax.random.normal(
            k_i, (n_item, hidden), dtype=jnp.float32)

        # Deterministic synthetic bipartite interaction graph (vectorized build),
        # then symmetric normalization D^{-1/2} A D^{-1/2} (as in getSparseGraph).
        N = n_user + n_item
        self.N = N
        uu = jnp.repeat(jnp.arange(n_user, dtype=jnp.int32), 3)
        tt = jnp.tile(jnp.arange(3, dtype=jnp.int32), n_user)
        it = (uu * 3 + tt) % n_item
        rows = jnp.concatenate([uu, n_user + it])
        cols = jnp.concatenate([n_user + it, uu])
        A = jnp.zeros((N, N), dtype=jnp.float32).at[rows, cols].set(1.0)
        deg = jnp.sum(A, axis=1)
        d_inv_sqrt = jnp.where(deg > 0, 1.0 / jnp.sqrt(deg), 0.0)
        self.graph = A * d_inv_sqrt[:, None] * d_inv_sqrt[None, :]  # f32 reference

        # --- padded / exact-int8 tensors for the kernels --------------------
        tile = max(tm, tk)
        self.N_pad = round_up(N, tile)
        self.H_pad = round_up(hidden, 128)   # lane-dense MXU output / stores
        # Exact 0/1 adjacency in int8 (half the HBM bytes of bf16; no rounding).
        a_pad = jnp.zeros((self.N_pad, self.N_pad), jnp.int8)
        a_pad = a_pad.at[:N, :N].set(A.astype(jnp.int8))
        self.adj_int8 = a_pad
        # d^{-1/2} as a (N_pad, 1) column, applied inside the kernel.
        self.dsqrt_col = jnp.zeros((self.N_pad, 1), jnp.float32).at[:N, 0].set(
            d_inv_sqrt)

        # --- block-sparsity metadata (scalar-prefetch tables) ---------------
        ni = self.N_pad // tm
        nk = self.N_pad // tk
        a_np = np.asarray(a_pad)
        blk_nnz = (a_np.reshape(ni, tm, nk, tk) != 0).any(axis=(1, 3))  # (ni, nk)
        counts = blk_nnz.sum(axis=1).astype(np.int32)
        max_nnz = max(int(counts.max()), 1)
        kidx = np.zeros((ni, max_nnz), dtype=np.int32)
        for i in range(ni):
            nz = np.flatnonzero(blk_nnz[i])
            if nz.size:
                kidx[i, :nz.size] = nz
                kidx[i, nz.size:] = nz[-1]   # repeat last valid -> no extra DMA
        self.blk_counts = jnp.asarray(counts)
        self.blk_kidx = jnp.asarray(kidx)

    def propagate(self):
        all_emb = jnp.concatenate([self.embedding_user, self.embedding_item], axis=0)
        emb_pad = jnp.zeros((self.N_pad, self.H_pad), jnp.float32)
        emb_pad = emb_pad.at[:self.N, :self.hidden].set(all_emb)
        final_pad = lightgcn_propagate(self.adj_int8, self.dsqrt_col, emb_pad,
                                       self.blk_counts, self.blk_kidx,
                                       self.n_layers, tm=self.tm, tk=self.tk)
        final = final_pad[:self.N, :]        # keep zero-padded hidden columns
        users = final[:self.n_user]
        items = final[self.n_user:]
        return users, items

    def forward(self, users: jnp.ndarray, items: jnp.ndarray):
        all_users, all_items = self.propagate()
        user_emb = all_users[users]          # gather = glue in plain JAX
        item_emb = all_items[items]
        B = users.shape[0]
        B_pad = round_up(B, 128)
        u_t = jnp.zeros((self.H_pad, B_pad), jnp.float32).at[:, :B].set(user_emb.T)
        i_t = jnp.zeros((self.H_pad, B_pad), jnp.float32).at[:, :B].set(item_emb.T)
        scores = lightgcn_score(u_t, i_t)
        return scores[0, :B]


# ----------------------------------------------------------------------------
# Pure-JAX (f32) reference for correctness check
# ----------------------------------------------------------------------------
def reference_forward(model: LightGCNPallas, users, items):
    all_emb = jnp.concatenate([model.embedding_user, model.embedding_item], axis=0)
    embs = [all_emb]
    e = all_emb
    for _ in range(model.n_layers):
        e = model.graph @ e
        embs.append(e)
    final = jnp.mean(jnp.stack(embs, axis=1), axis=1)
    u = final[: model.n_user][users]
    i = final[model.n_user:][items]
    return jnp.sum(u * i, axis=-1)


if __name__ == "__main__":
    key = jax.random.PRNGKey(0)
    k_param, k_u, k_i = jax.random.split(key, 3)

    # Small but multi-tile: N = 400 -> padded 512 -> 2x(up to 2) tile grid at
    # tm=tk=256, exercising the block-sparse skip path; hidden 32 padded to 128.
    n_user, n_item, hidden, n_layers = 150, 250, 32, 3
    batch = 16

    model = LightGCNPallas(n_user, n_item, hidden, n_layers, k_param)

    users = jax.random.randint(k_u, (batch,), 0, n_user, dtype=jnp.int32)
    items = jax.random.randint(k_i, (batch,), 0, n_item, dtype=jnp.int32)

    scores = model.forward(users, items)
    scores = jax.block_until_ready(scores)

    ref = reference_forward(model, users, items)
    assert scores.shape == (batch,)
    # Graph is exact int8 now; remaining error is the bf16 rounding of the
    # propagated Y_l between layers -> relaxed tolerance kept with margin.
    assert jnp.allclose(scores, ref, atol=5e-3, rtol=5e-2), (scores, ref)

    print("KERNEL_OK")
</pallas_src>

<mosaic_0001>
module attributes {stable_mosaic.version = 11 : i64} {
  func.func @propagate_layer_kernel(%arg0: i32, %arg1: i32, %arg2: memref<2xi32, #tpu.memory_space<smem>>, %arg3: memref<2x2xi32, #tpu.memory_space<smem>>, %arg4: memref<256x256xi8, #tpu.memory_space<vmem>>, %arg5: memref<256x1xf32, #tpu.memory_space<vmem>>, %arg6: memref<512x128xbf16, #tpu.memory_space<vmem>>, %arg7: memref<256x128xf32, #tpu.memory_space<vmem>>, %arg8: memref<256x128xbf16, #tpu.memory_space<vmem>>, %arg9: memref<256x128xf32, #tpu.memory_space<vmem>>, %arg10: memref<256x128xf32, #tpu.memory_space<vmem>>) attributes {dimension_semantics = [#tpu.dimension_semantics<parallel>, #tpu.dimension_semantics<arbitrary>], iteration_bounds = array<i64: 2, 2>, scalar_prefetch = 2 : i64, scratch_operands = 1 : i64, tpu.core_type = #tpu.core_type<tc>, window_params = [{transform_indices = @transform_0, window_bounds = array<i64: 256, 256>}, {transform_indices = @transform_1, window_bounds = array<i64: 256, 1>}, {pipeline_mode = #tpu.pipeline_mode<synchronous>, transform_indices = @transform_2, window_bounds = array<i64: 512, 128>}, {transform_indices = @transform_3, window_bounds = array<i64: 256, 128>}, {transform_indices = @transform_4, window_bounds = array<i64: 256, 128>}, {transform_indices = @transform_5, window_bounds = array<i64: 256, 128>}]} {
    %c0_i32 = arith.constant 0 : i32
    %0 = arith.cmpi eq, %arg1, %c0_i32 : i32
    %1 = arith.extui %0 : i1 to i32
    %c0_i32_0 = arith.constant 0 : i32
    %2 = arith.cmpi ne, %1, %c0_i32_0 : i32
    scf.if %2 {
      %cst = arith.constant 0.000000e+00 : f32
      %11 = vector.broadcast %cst : f32 to vector<256x128xf32>
      %c0 = arith.constant 0 : index
      %c0_3 = arith.constant 0 : index
      %12 = vector.load %arg10[%c0, %c0_3] : memref<256x128xf32, #tpu.memory_space<vmem>>, vector<256x128xf32>
      tpu.vector_store %arg10[%c0, %c0_3], %11 {strides = array<i32>} : memref<256x128xf32, #tpu.memory_space<vmem>>, vector<256x128xf32>,
    } else {
    }
    %3 = arith.index_cast %arg0 : i32 to index
    %4 = memref.load %arg2[%3] : memref<2xi32, #tpu.memory_space<smem>>
    %5 = arith.cmpi slt, %arg1, %4 : i32
    %6 = arith.extui %5 : i1 to i32
    %c0_i32_1 = arith.constant 0 : i32
    %7 = arith.cmpi ne, %6, %c0_i32_1 : i32
    scf.if %7 {
      %11 = arith.index_cast %arg0 : i32 to index
      %12 = arith.index_cast %arg1 : i32 to index
      %13 = memref.load %arg3[%11, %12] : memref<2x2xi32, #tpu.memory_space<smem>>
      %c256_i32 = arith.constant 256 : i32
      %14 = arith.muli %13, %c256_i32 : i32
      %15 = tpu.assume_multiple %14, 256 : i32
      %16 = arith.index_cast %15 : i32 to index
      %c0 = arith.constant 0 : index
      %17 = vector.load %arg6[%16, %c0] : memref<512x128xbf16, #tpu.memory_space<vmem>>, vector<256x128xbf16>
      %c0_3 = arith.constant 0 : index
      %c0_4 = arith.constant 0 : index
      %18 = vector.load %arg4[%c0_3, %c0_4] : memref<256x256xi8, #tpu.memory_space<vmem>>, vector<256x256xi8>
      %19 = arith.sitofp %18 : vector<256x256xi8> to vector<256x256xf32>
      %20 = arith.truncf %19 : vector<256x256xf32> to vector<256x256xbf16>
      %c0_5 = arith.constant 0 : index
      %c0_6 = arith.constant 0 : index
      %21 = vector.load %arg10[%c0_5, %c0_6] : memref<256x128xf32, #tpu.memory_space<vmem>>, vector<256x128xf32>
      %cst = arith.constant dense<0.000000e+00> : vector<256x128xf32>
      %22 = tpu.matmul %20, %17, %cst {dimension_numbers = #tpu.dot_dimension_numbers<[1], [0], [0], [1], [0, 0, 1, 1], [], []>} : vector<256x256xbf16>, vector<256x128xbf16>, vector<256x128xf32> -> vector<256x128xf32>
      %23 = arith.addf %21, %22 : vector<256x128xf32>
      %c0_7 = arith.constant 0 : index
      %c0_8 = arith.constant 0 : index
      %24 = vector.load %arg10[%c0_7, %c0_8] : memref<256x128xf32, #tpu.memory_space<vmem>>, vector<256x128xf32>
      tpu.vector_store %arg10[%c0_7, %c0_8], %23 {strides = array<i32>} : memref<256x128xf32, #tpu.memory_space<vmem>>, vector<256x128xf32>,
    } else {
    }
    %c1_i32 = arith.constant 1 : i32
    %8 = arith.cmpi eq, %arg1, %c1_i32 : i32
    %9 = arith.extui %8 : i1 to i32
    %c0_i32_2 = arith.constant 0 : i32
    %10 = arith.cmpi ne, %9, %c0_i32_2 : i32
    scf.if %10 {
      %c0 = arith.constant 0 : index
      %c0_3 = arith.constant 0 : index
      %11 = vector.load %arg5[%c0, %c0_3] : memref<256x1xf32, #tpu.memory_space<vmem>>, vector<256x1xf32>
      %c0_4 = arith.constant 0 : index
      %c0_5 = arith.constant 0 : index
      %12 = vector.load %arg10[%c0_4, %c0_5] : memref<256x128xf32, #tpu.memory_space<vmem>>, vector<256x128xf32>
      %13 = vector.broadcast %11 : vector<256x1xf32> to vector<256x128xf32>
      %14 = arith.mulf %13, %12 : vector<256x128xf32>
      %c0_6 = arith.constant 0 : index
      %c0_7 = arith.constant 0 : index
      %15 = vector.load %arg7[%c0_6, %c0_7] : memref<256x128xf32, #tpu.memory_space<vmem>>, vector<256x128xf32>
      %16 = arith.addf %15, %14 : vector<256x128xf32>
      %c0_8 = arith.constant 0 : index
      %c0_9 = arith.constant 0 : index
      %17 = vector.load %arg9[%c0_8, %c0_9] : memref<256x128xf32, #tpu.memory_space<vmem>>, vector<256x128xf32>
      tpu.vector_store %arg9[%c0_8, %c0_9], %16 {strides = array<i32>} : memref<256x128xf32, #tpu.memory_space<vmem>>, vector<256x128xf32>,
      %18 = vector.broadcast %11 : vector<256x1xf32> to vector<256x128xf32>
      %19 = arith.mulf %18, %14 : vector<256x128xf32>
      %20 = arith.truncf %19 : vector<256x128xf32> to vector<256x128xbf16>
      %c0_10 = arith.constant 0 : index
      %c0_11 = arith.constant 0 : index
      %21 = vector.load %arg8[%c0_10, %c0_11] : memref<256x128xbf16, #tpu.memory_space<vmem>>, vector<256x128xbf16>
      tpu.vector_store %arg8[%c0_10, %c0_11], %20 {strides = array<i32>} : memref<256x128xbf16, #tpu.memory_space<vmem>>, vector<256x128xbf16>,
    } else {
    }
    return
  }
  func.func @transform_0(%arg0: i32, %arg1: i32, %arg2: memref<2xi32, #tpu.memory_space<smem>>, %arg3: memref<2x2xi32, #tpu.memory_space<smem>>) -> (i32, i32) {
    %0 = arith.index_cast %arg0 : i32 to index
    %1 = arith.index_cast %arg1 : i32 to index
    %2 = memref.load %arg3[%0, %1] : memref<2x2xi32, #tpu.memory_space<smem>>
    %c0_i32 = arith.constant 0 : i32
    return %arg0, %2 : i32, i32
  }
  func.func @transform_1(%arg0: i32, %arg1: i32, %arg2: memref<2xi32, #tpu.memory_space<smem>>, %arg3: memref<2x2xi32, #tpu.memory_space<smem>>) -> (i32, i32) {
    %c0_i32 = arith.constant 0 : i32
    %c0_i32_0 = arith.constant 0 : i32
    return %arg0, %c0_i32 : i32, i32
  }
  func.func @transform_2(%arg0: i32, %arg1: i32, %arg2: memref<2xi32, #tpu.memory_space<smem>>, %arg3: memref<2x2xi32, #tpu.memory_space<smem>>) -> (i32, i32) {
    %c0_i32 = arith.constant 0 : i32
    %c0_i32_0 = arith.constant 0 : i32
    %c0_i32_1 = arith.constant 0 : i32
    return %c0_i32, %c0_i32_0 : i32, i32
  }
  func.func @transform_3(%arg0: i32, %arg1: i32, %arg2: memref<2xi32, #tpu.memory_space<smem>>, %arg3: memref<2x2xi32, #tpu.memory_space<smem>>) -> (i32, i32) {
    %c0_i32 = arith.constant 0 : i32
    %c0_i32_0 = arith.constant 0 : i32
    return %arg0, %c0_i32 : i32, i32
  }
  func.func @transform_4(%arg0: i32, %arg1: i32, %arg2: memref<2xi32, #tpu.memory_space<smem>>, %arg3: memref<2x2xi32, #tpu.memory_space<smem>>) -> (i32, i32) {
    %c0_i32 = arith.constant 0 : i32
    %c0_i32_0 = arith.constant 0 : i32
    return %arg0, %c0_i32 : i32, i32
  }
  func.func @transform_5(%arg0: i32, %arg1: i32, %arg2: memref<2xi32, #tpu.memory_space<smem>>, %arg3: memref<2x2xi32, #tpu.memory_space<smem>>) -> (i32, i32) {
    %c0_i32 = arith.constant 0 : i32
    %c0_i32_0 = arith.constant 0 : i32
    return %arg0, %c0_i32 : i32, i32
  }
}

</mosaic_0001>

<bundles_post_ra>
// kernel: tpu_custom_call.1
= control target key start
LH: loop header
LB: loop body
LE: loop exit
PB: predicated region body
PF: predicated region fallthrough
CT: control target
= control target key end

     0   :  { %s2820_s0 = inlined_call_operand.vmem [shape: s32[2], index: 0, kind: input, shape index: {}]   ;;  %s2821_s2 = inlined_call_operand.vmem [shape: s8[512,512], index: 2, kind: input, shape index: {}]   ;;  %s2822_s3 = inlined_call_operand.vmem [shape: f32[512,1], index: 3, kind: input, shape index: {}]   ;;  %s2823_s4 = inlined_call_operand.vmem [shape: bf16[512,128], index: 4, kind: input, shape index: {}]   ;;  %s2824_s5 = inlined_call_operand.hbm [shape: f32[512,128], index: 5, kind: input, shape index: {}, may-alias: {5,7}]   ;;  %s2825_s6 = inlined_call_operand.hbm [shape: bf16[512,128], index: 6, kind: output, shape index: {0}]   ;;  %s2826_s7 = inlined_call_operand.hbm [shape: f32[512,128], index: 7, kind: output, shape index: {1}, may-alias: {5,7}]   ;;  %s2827_s1 = inlined_call_operand.vmem [shape: s32[2,2], index: 1, kind: input, shape index: {}]  }
   0x1   :  { %2833 = sst [smem:[#allocation22_spill]] %s2821_s2  ;;  %s13_s26 = sshll.u32 %s2820_s0, 4  ;;  %s14_s26 = int_to_ptr.vmem [resolvable:$true] %s13_s26 }
   0x2   :  { %2834 = sst [smem:[#allocation23_spill]] %s2822_s3  ;;  %s17_s29 = sshll.u32 %s2827_s1, 4  ;;  %s18_s29 = int_to_ptr.vmem [resolvable:$true] %s17_s29 }
   0x3   :  { %2835 = sst [smem:[#allocation24_spill]] %s2824_s5  ;;  %s2099_s30 = scalar_lea.vmem %s14_s26, 16 }
   0x4   :  { %p2100_p0 = scmp.ne.s32.totalorder %s14_s26, %s2099_s30  ;;  %p2104_p1 = scmp.lt.s32.totalorder %s14_s26, %s14_s26 }
   0x5   :  { %p2105_p2 = scmp.lt.s32.totalorder %s2099_s30, %s2099_s30 }
   0x7   :  { %p2106_p3 = por %p2105_p2, %p2104_p1 }
   0x9   :  { %p2107_p4 = pnand %p2106_p3, %p2100_p0 }
   0xb   :  { %2110 = shalt.err (!%p2107_p4)  }
   0xc   :  { %s2301_s8 = smov [#allocation4]   ;;  %s2111_s9 = scalar_lea.vmem %s18_s29, 32 }
   0xd   :  { %16 = dma.vmem_to_smem %s14_s26, 16, %s2301_s8, [#allocation3] }
   0xe   :  { %p2112_p5 = scmp.ne.s32.totalorder %s18_s29, %s2111_s9  ;;  %p2116_p6 = scmp.lt.s32.totalorder %s18_s29, %s18_s29 }
   0xf   :  { %p2117_p7 = scmp.lt.s32.totalorder %s2111_s9, %s2111_s9 }
  0x11   :  { %p2118_p8 = por %p2117_p7, %p2116_p6 }
  0x13   :  { %p2119_p9 = pnand %p2118_p8, %p2112_p5 }
  0x15   :  { %2122 = shalt.err (!%p2119_p9)  }
  0x16   :  { %s2302_s0 = smov [#allocation5]  }
  0x17   :  { %20 = dma.vmem_to_smem %s18_s29, 32, %s2302_s0, [#allocation3] }
  0x18   :  { %2247 = dma.done.wait [#allocation3], 48 }
  0x19   :  { %2248 = vsyncadd [#allocation3], 4294967248 }
  0x1a   :  { %22 = sfence }
  0x1b   :  { %23 = vsyncpa [#allocation8], 0 }
  0x1c   :  { %25 = vsyncpa [#allocation8 + $0x1], 0 }
  0x1d   :  { %26 = vsyncpa [#allocation9], 0 }
  0x1e   :  { %28 = vsyncpa [#allocation9 + $0x1], 0 }
  0x1f   :  { %29 = vsyncpa [#allocation12], 0 }
  0x20   :  { %31 = vsyncpa [#allocation12 + $0x1], 0  ;;  %s2360_s1 = smov 0   ;;  %s2362_s10 = smov 0  }
  0x21   :  { %s2364_s11 = smov 0   ;;  %s2366_s12 = smov 0  }
  0x22   :  { %s2368_s13 = smov 0   ;;  %s2370_s14 = smov 0  }
  0x23   :  { %s2372_s15 = smov 0   ;;  %s2374_s16 = smov 0  }
  0x24   :  { %s2376_s17 = smov 0   ;;  %s2378_s18 = smov 0  }
  0x25 LB: > { %2836 = sst [smem:[#allocation17_spill]] %s2291_s16  ;;  %s46_s20 = sadd.s32 1, %s2291_s16  ;;  %s2299_s18 = sphi %s2378_s18, %s37_s18   ;;  %s2295_s17 = sphi %s2376_s17, %s2864_s17   ;;  %s2291_s16 = sphi %s2374_s16, %s2856_s16   ;;  %s2287_s15 = sphi %s2372_s15, %s2863_s15   ;;  %s2283_s14 = sphi %s2370_s14, %s2855_s14   ;;  %s2279_s13 = sphi %s2368_s13, %s2862_s13   ;;  %s2275_s12 = sphi %s2366_s12, %s2861_s12   ;;  %s2271_s11 = sphi %s2364_s11, %s2860_s11   ;;  %s2267_s10 = sphi %s2362_s10, %s2859_s10   ;;  %s2263_s1 = sphi %s2360_s1, %s2858_s1  }
  0x26   : > { %s49_s21 = sadd.s32 1, %s2295_s17  ;;  %p47_p10 = scmp.ge.s32.totalorder %s46_s20, 2 }
  0x27   : > { %s53_s22 = sshra.s32 %s2291_s16, 7  ;;  %s58_s24 = sand.u32 127, %s2291_s16 }
  0x28   : > { %s55_s23 = sadd.s32 %s2295_s17, %s53_s22  ;;  %s2866_s20 = smov (%p47_p10, %s46_s20), 0 }
  0x29   : > { %2837 = sst [smem:[#allocation18_spill]] %s2866_s20  ;;  %s2868_s21 = smov (!%p47_p10, %s49_s21), %s2295_s17 }
  0x2a   : > { %s1635_s25 = sadd.s32 4294967294, %s2299_s18   ;;  %s1636_s26 = sshll.u32 %s55_s23, 7 }
  0x2b   : > { %p51_p11 = scmp.ge.s32.totalorder %s2868_s21, 2  ;;  %s2420_s27 = sadd.s32 %s1636_s26, %s58_s24 }
  0x2c   : > { %s60_s28 = sld [smem:[#allocation5 + %s2420_s27]]  ;;  %s61_s29 = sshra.s32 %s2866_s20, 7 }
  0x2d   : > { %s2870_s21 = smov (%p51_p11, %s2868_s21), 0  ;;  %s66_s30 = sand.u32 127, %s2866_s20 }
  0x2e   : > { %2838 = sst [smem:[#allocation19_spill]] %s2870_s21  ;;  %p81_p12 = scmp.ne.s32.totalorder %s2279_s13, %s2275_s12 }
  0x2f   : > { %s63_s8 = sadd.s32 %s61_s29, %s2870_s21  ;;  %s69_s9 = ssub.s32 %s2295_s17, %s2870_s21 }
  0x30   : > { %s1637_s0 = sshll.u32 %s63_s8, 7  ;;  %p82_p13 = scmp.eq.s32.totalorder %s2299_s18, 0 }
  0x31   : > { %s67_s22 = sadd.s32 %s1637_s0, %s66_s30  ;;  %p145_p0 = scmp.eq.s32.totalorder %s69_s9, 0 }
  0x32   : > { %s68_s23 = sld [smem:[#allocation5 + %s67_s22]]  ;;  %p2433_p1 = por %p82_p13, %p81_p12 }
  0x33   : > { %s147_s26 = sadd.s32 1, %s2271_s11  ;;  %p154_p2 = scmp.ne.s32.totalorder %s2271_s11, %s2267_s10 }
  0x34   : > { %s2441_s19 = scalar_select %p145_p0, %s2271_s11, %s147_s26  }
  0x35   : > { %p2443_p3 = por %p154_p2, %p82_p13  ;;  %p160_p4 = scmp.ne.s32.totalorder %s2267_s10, %s2263_s1 }
  0x36   : > { %2840 = sst [smem:[#allocation20_spill]] %s2441_s19  ;;  %s2842_s29 = sadd.s32 4294967295, %s2299_s18  }
  0x37   : > { %p161_p5 = scmp.eq.s32.totalorder %s2842_s29, 0  ;;  %s2843_s8 = smov %s2842_s29 }
  0x38   : > { %p184_p6 = scmp.eq.s32.totalorder %s2843_s8, 3  ;;  %s74_s30 = sadd.s32 1, %s2279_s13 }
  0x39   : > { %p190_p7 = scmp.eq.s32.totalorder %s1635_s25, 3  ;;  %s70_s0 = ssub.s32 %s60_s28, %s68_s23 }
  0x3a   : > { %p2454_p8 = por %p161_p5, %p160_p4  ;;  %s71_s21 = sor.u32 %s70_s0, %s69_s9 }
  0x3b   : > { %p2458_p9 = por %p184_p6, %p154_p2  ;;  %p72_p10 = scmp.eq.s32.totalorder %s71_s21, 0 }
  0x3c   : > { %p2462_p11 = por %p190_p7, %p160_p4  ;;  %p1639_p12 = scmp.ge.s32.totalorder %s2299_s18, 4 }
  0x3d   : > { %s2845_s26 = scalar_select %p2458_p9, 1, 0 }
  0x3e   : > { %s2846_s16 = scalar_select %p2462_p11, 1, 0 }
  0x3f   : > { %s2467_s29 = scalar_select %p72_p10, %s2279_s13, %s74_s30  }
  0x40   : > { %2847 = sst [smem:[#allocation21_spill]] %s2846_s16  ;;  %235 = sbr.rel (%p1639_p12) target bundleno = 120 (0x78), region = 20 }
  0x47   : > { %238 = sbr.rel (!%p2433_p1) target bundleno = 90 (0x5a), region = 24  ;;  %s250_s25 = sld [smem:[#allocation5 + %s2420_s27]] (%p2433_p1) }
  0x48   : > { %s240_s28 = sand.u32 (%p2433_p1), 1, %s2279_s13   ;;  %s1718_s9 = sshll.u32 (%p2433_p1), %s2295_s17, 5 }
  0x49   : > { %s1640_s23 = sshll.u32 (%p2433_p1), %s240_s28, 7  ;;  %s2848_s2 = sld [smem:[#allocation22_spill]] (%p2433_p1) }
  0x4a   : > { %s242_s27 = scalar_lea.vmem (%p2433_p1), [#allocation6], %s1640_s23 }
  0x4d   : > { %s1643_s21 = sshll.u32 (%p2433_p1), %s250_s25, 1 }
  0x4e   : > { %s254_s8 = sadd.s32 %s1718_s9, %s1643_s21 }
  0x4f   : > { %s1645_s0 = sshll.u32 %s254_s8, 3 }
  0x50   : > { %s2478_s30 = scalar_lea.vmem %s2848_s2, %s1645_s0 }
  0x51   : > { %v269_v0 = vld [vmem:[%s2478_s30] sm:$0xff]  ;;  %v271_v1 = vld [vmem:[%s2478_s30 + $0x8] sm:$0xff] }
  0x52   : > { %v273_v2 = vld [vmem:[%s2478_s30 + $0x20] sm:$0xff]  ;;  %270 = vst [vmem:[%s242_s27] sm:$0xff] %v269_v0  ;;  %272 = vst [vmem:[%s242_s27 + $0x8] sm:$0xff] %v271_v1  ;;  %v275_v3 = vld [vmem:[%s2478_s30 + $0x28] sm:$0xff] }
  0x53   : > { %274 = vst [vmem:[%s242_s27 + $0x10] sm:$0xff] %v273_v2  ;;  %v277_v4 = vld [vmem:[%s2478_s30 + $0x40] sm:$0xff]  ;;  %v279_v5 = vld [vmem:[%s2478_s30 + $0x48] sm:$0xff]  ;;  %276 = vst [vmem:[%s242_s27 + $0x18] sm:$0xff] %v275_v3 }
  0x54   : > { %278 = vst [vmem:[%s242_s27 + $0x20] sm:$0xff] %v277_v4  ;;  %280 = vst [vmem:[%s242_s27 + $0x28] sm:$0xff] %v279_v5  ;;  %v281_v6 = vld [vmem:[%s2478_s30 + $0x60] sm:$0xff]  ;;  %v283_v7 = vld [vmem:[%s2478_s30 + $0x68] sm:$0xff] }
  0x55   : > { %v285_v8 = vld [vmem:[%s2478_s30 + $0x80] sm:$0xff]  ;;  %282 = vst [vmem:[%s242_s27 + $0x30] sm:$0xff] %v281_v6  ;;  %284 = vst [vmem:[%s242_s27 + $0x38] sm:$0xff] %v283_v7  ;;  %v287_v9 = vld [vmem:[%s2478_s30 + $0x88] sm:$0xff] }
  0x56   : > { %286 = vst [vmem:[%s242_s27 + $0x40] sm:$0xff] %v285_v8  ;;  %v289_v10 = vld [vmem:[%s2478_s30 + $0xa0] sm:$0xff]  ;;  %v291_v11 = vld [vmem:[%s2478_s30 + $0xa8] sm:$0xff]  ;;  %288 = vst [vmem:[%s242_s27 + $0x48] sm:$0xff] %v287_v9 }
  0x57   : > { %290 = vst [vmem:[%s242_s27 + $0x50] sm:$0xff] %v289_v10  ;;  %292 = vst [vmem:[%s242_s27 + $0x58] sm:$0xff] %v291_v11  ;;  %v293_v12 = vld [vmem:[%s2478_s30 + $0xc0] sm:$0xff]  ;;  %v295_v13 = vld [vmem:[%s2478_s30 + $0xc8] sm:$0xff] }
  0x58   : > { %v297_v14 = vld [vmem:[%s2478_s30 + $0xe0] sm:$0xff]  ;;  %294 = vst [vmem:[%s242_s27 + $0x60] sm:$0xff] %v293_v12  ;;  %296 = vst [vmem:[%s242_s27 + $0x68] sm:$0xff] %v295_v13  ;;  %v299_v15 = vld [vmem:[%s2478_s30 + $0xe8] sm:$0xff] }
  0x59   : > { %298 = vst [vmem:[%s242_s27 + $0x70] sm:$0xff] %v297_v14  ;;  %300 = vst [vmem:[%s242_s27 + $0x78] sm:$0xff] %v299_v15 }
  0x5a PF: > { %s316_s16 = sand.u32 1, %s2271_s11   ;;  %s1719_s19 = sshll.u32 %s2295_s17, 12 }
  0x5b   : > { %s1646_s24 = sshll.u32 %s316_s16, 8  ;;  %s2849_s5 = sld [smem:[#allocation24_spill]] }
  0x5c   : > { %s320_s23 = scalar_lea.vmem [#allocation7], %s1646_s24  ;;  %s2505_s8 = scalar_lea.sflag [#allocation8], %s316_s16 }
  0x5d   : > { %s327_s21 = sshll.u32 %s320_s23, 4  ;;  %s2503_s21 = int_to_ptr.vmem [resolvable:$true] %s327_s21 }
  0x61   : > { %s2501_s9 = scalar_lea.hbm %s2849_s5, %s1719_s19  ;;  %s2127_s19 = scalar_lea.hbm %s2849_s5, 8192 }
  0x62   : > { %s2123_s0 = scalar_lea.hbm %s2501_s9, 4096  ;;  %p2128_p2 = scmp.lt.u32.totalorder %s2501_s9, %s2849_s5 }
  0x63   : > { %p2124_p13 = scmp.ne.s32.totalorder %s2501_s9, %s2123_s0  ;;  %p2129_p4 = scmp.lt.u32.totalorder %s2127_s19, %s2123_s0 }
  0x64   : > { %p2131_p6 = scmp.lt.u32.totalorder %s2123_s0, %s2501_s9 }
  0x65   : > { %p2125_p0 = pnand %p2124_p13, %p2443_p3  ;;  %p2130_p5 = por %p2129_p4, %p2128_p2 }
  0x67   : > { %p2126_p1 = pneg %p2125_p0  ;;  %p2132_p7 = por %p2131_p6, %p2130_p5 }
  0x69   : > { %p2133_p10 = pnand %p2132_p7, %p2126_p1 }
  0x6b   : > { %2136 = shalt.err (!%p2133_p10)
}
  0x6c   : > { %s2137_s16 = scalar_lea.vmem %s2503_s21, 4096  ;;  %s2303_s24 = smov [#allocation7]  }
  0x6d   : > { %p2138_p12 = scmp.ne.s32.totalorder %s2503_s21, %s2137_s16  ;;  %s2141_s23 = sshll.u32 %s2303_s24, 4  ;;  %s2142_s23 = int_to_ptr.vmem [resolvable:$false] %s2141_s23 }
  0x6e   : > { %s2143_s30 = scalar_lea.vmem %s2142_s23, 8192  ;;  %p2144_p11 = scmp.lt.s32.totalorder %s2503_s21, %s2142_s23 }
  0x6f   : > { %p2139_p13 = pnand %p2138_p12, %p2443_p3  ;;  %p2145_p9 = scmp.lt.s32.totalorder %s2143_s30, %s2137_s16 }
  0x71   : > { %p2140_p0 = pneg %p2139_p13  ;;  %p2146_p2 = por %p2145_p9, %p2144_p11 }
  0x73   : > { %p2147_p4 = pnand %p2146_p2, %p2140_p0 }
  0x75   : > { %2150 = shalt.err (!%p2147_p4)
}
  0x76   : > { %s2304_s0 = smov 128   ;;  %s2305_s27 = smov 8  }
  0x77   : > { %1977 = dma.hbm_to_vmem [thread:$0]  (%p2443_p3), %s2501_s9, 4096, %s2503_s21, %s2505_s8, %s2304_s0, %s2304_s0, %s2305_s27  }
  0x78 PF: > { %p1649_p1 = scmp.ge.s32.totalorder %s2299_s18, 1  ;;  %p335_p5 = scmp.lt.s32.totalorder %s2299_s18, 5 }
  0x7a   : > { %p336_p6 = pnand %p1649_p1, %p335_p5 }
  0x7b   : > { %s342_s19 = sand.u32 (!%p336_p6), 1, %s2275_s12   ;;  %s2533_s25 = sand.u32 (!%p336_p6), 1, %s2267_s10  }
  0x7c   : > { %339 = sbr.rel (%p336_p6) target bundleno = 732 (0x2dc), region = 55  ;;  %s1650_s28 = sshll.u32 (!%p336_p6), %s342_s19, 7 }
  0x7d   : > { %s1651_s16 = sshll.u32 (!%p336_p6), %s2533_s25, 8  ;;  %s2536_s24 = scalar_lea.vmem (!%p336_p6), [#allocation6], %s1650_s28 }
  0x7e   : > { %s349_s20 = scalar_lea.sflag (!%p336_p6), [#allocation8], %s2533_s25  ;;  %s2539_s9 = scalar_lea.vmem (!%p336_p6), [#allocation7], %s1651_s16 }
  0x83   : > { %2250 = dma.done.wait (%p2454_p8), %s349_s20, 4096  }
  0x84   : > { %2252 = vsyncadd (%p2454_p8), %s349_s20, 4294963200  ;;  %s1652_s21 = sshll.u32 %s2533_s25, 7  ;;  %s1654_s12 = sshll.u32 %s2287_s15, 5 }
  0x85   : > { %p404_p3 = scmp.lt.s32.totalorder %s1654_s12, 63  ;;  %s2850_s3 = sld [smem:[#allocation23_spill]] }
  0x86   : > { %s2552_s27 = scalar_lea.vmem [#allocation10], %s1652_s21  ;;  %s2554_s19 = scalar_lea.vmem [#allocation11], %s1651_s16 }
  0x87   : > { %s2872_s12 = smov (!%p404_p3, %s1654_s12), 63  ;;  %p1656_p9 = scmp.ne.s32.totalorder %s2283_s14, 0 }
  0x88   : > { %s1655_s8 = sshll.u32 %s2872_s12, 3  ;;  %v2306_v16 = vmov (!%p1656_p9), 0.0  }
  0x89   : > { %416 = sbr.rel (%p1656_p9) target bundleno = 153 (0x99), region = 67  ;;  %417 = vst [vmem:[#allocation2] sm:$0xff] (!%p1656_p9), %v2306_v16  ;;  %418 = vst [vmem:[#allocation2 + $0x8] sm:$0xff] (!%p1656_p9), %v2306_v16 }
  0x8a   : > { %419 = vst [vmem:[#allocation2 + $0x10] sm:$0xff] (!%p1656_p9), %v2306_v16  ;;  %420 = vst [vmem:[#allocation2 + $0x18] sm:$0xff] (!%p1656_p9), %v2306_v16 }
  0x8b   : > { %s2550_s0 = scalar_lea.vmem %s2850_s3, %s1655_s8  ;;  %421 = vst [vmem:[#allocation2 + $0x20] sm:$0xff] (!%p1656_p9), %v2306_v16  ;;  %422 = vst [vmem:[#allocation2 + $0x28] sm:$0xff] (!%p1656_p9), %v2306_v16 }
  0x8c   : > { %423 = vst [vmem:[#allocation2 + $0x30] sm:$0xff] (!%p1656_p9), %v2306_v16  ;;  %424 = vst [vmem:[#allocation2 + $0x38] sm:$0xff] (!%p1656_p9), %v2306_v16 }
  0x8d   : > { %425 = vst [vmem:[#allocation2 + $0x40] sm:$0xff] (!%p1656_p9), %v2306_v16  ;;  %426 = vst [vmem:[#allocation2 + $0x48] sm:$0xff] (!%p1656_p9), %v2306_v16 }
  0x8e   : > { %427 = vst [vmem:[#allocation2 + $0x50] sm:$0xff] (!%p1656_p9), %v2306_v16  ;;  %428 = vst [vmem:[#allocation2 + $0x58] sm:$0xff] (!%p1656_p9), %v2306_v16 }
  0x8f   : > { %429 = vst [vmem:[#allocation2 + $0x60] sm:$0xff] (!%p1656_p9), %v2306_v16  ;;  %430 = vst [vmem:[#allocation2 + $0x68] sm:$0xff] (!%p1656_p9), %v2306_v16 }
  0x90   : > { %431 = vst [vmem:[#allocation2 + $0x70] sm:$0xff] %v2306_v16  ;;  %432 = vst [vmem:[#allocation2 + $0x78] sm:$0xff] %v2306_v16 }
  0x91   : > { %433 = vst [vmem:[#allocation2 + $0x80] sm:$0xff] %v2306_v16  ;;  %434 = vst [vmem:[#allocation2 + $0x88] sm:$0xff] %v2306_v16 }
  0x92   : > { %435 = vst [vmem:[#allocation2 + $0x90] sm:$0xff] %v2306_v16  ;;  %436 = vst [vmem:[#allocation2 + $0x98] sm:$0xff] %v2306_v16 }
  0x93   : > { %437 = vst [vmem:[#allocation2 + $0xa0] sm:$0xff] %v2306_v16  ;;  %438 = vst [vmem:[#allocation2 + $0xa8] sm:$0xff] %v2306_v16 }
  0x94   : > { %439 = vst [vmem:[#allocation2 + $0xb0] sm:$0xff] %v2306_v16  ;;  %440 = vst [vmem:[#allocation2 + $0xb8] sm:$0xff] %v2306_v16 }
  0x95   : > { %441 = vst [vmem:[#allocation2 + $0xc0] sm:$0xff] %v2306_v16  ;;  %442 = vst [vmem:[#allocation2 + $0xc8] sm:$0xff] %v2306_v16 }
  0x96   : > { %443 = vst [vmem:[#allocation2 + $0xd0] sm:$0xff] %v2306_v16  ;;  %444 = vst [vmem:[#allocation2 + $0xd8] sm:$0xff] %v2306_v16 }
  0x97   : > { %445 = vst [vmem:[#allocation2 + $0xe0] sm:$0xff] %v2306_v16  ;;  %446 = vst [vmem:[#allocation2 + $0xe8] sm:$0xff] %v2306_v16 }
  0x98   : > { %447 = vst [vmem:[#allocation2 + $0xf0] sm:$0xff] %v2306_v16  ;;  %448 = vst [vmem:[#allocation2 + $0xf8] sm:$0xff] %v2306_v16 }
  0x99 PF: > { %s449_s22 = sld [smem:[#allocation4 + %s2287_s15]] }
  0x9f   : > { %p1657_p8 = scmp.ge.s32.totalorder %s2283_s14, %s449_s22 }
  0xa0   : > { %s454_s28 = sshra.s32 (!%p1657_p8), %s2283_s14, 7  ;;  %s459_s16 = sand.u32 (!%p1657_p8), 127, %s2283_s14  ;;  %v2562_v17 = vld [vmem:[%s2536_s24 + $0x8] sm:$0xff] (!%p1657_p8)  ;;  %v499_v37 = vld [vmem:[%s2536_s24] sm:$0xff] (!%p1657_p8)  ;;  %v502_v43 = vld [vmem:[%s2536_s24 + $0x18] sm:$0xff] (!%p1657_p8) }
  0xa1   : > { %453 = sbr.rel (%p1657_p8) target bundleno = 483 (0x1e3), region = 71  ;;  %v2565_v18 = vld [vmem:[%s2536_s24 + $0x48] sm:$0xff] (!%p1657_p8)  ;;  %s456_s20 = sadd.s32 (!%p1657_p8), %s2287_s15, %s454_s28  ;;  %v516_v19 = vunpack.c.l.s8.bf16 (!%p1657_p8), %v2562_v17  ;;  %v507_v38 = vld [vmem:[%s2536_s24 + $0x40] sm:$0xff] (!%p1657_p8)  ;;  %v515_v39 = vunpack.c.l.s8.bf16 (!%p1657_p8), %v499_v37  ;;  %v518_v41 = vunpack.c.h.s8.bf16 (!%p1657_p8), %v2562_v17  ;;  %v510_v44 = vld [vmem:[%s2536_s24 + $0x58] sm:$0xff] (!%p1657_p8)  ;;  %v517_v45 = vunpack.c.h.s8.bf16 (!%p1657_p8), %v499_v37 }
  0xa2   : > { %v532_v20 = vunpack.c.l.s8.bf16 (!%p1657_p8), %v2565_v18  ;;  %s1658_s21 = sshll.u32 (!%p1657_p8), %s456_s20, 7  ;;  %v531_v40 = vunpack.c.l.s8.bf16 (!%p1657_p8), %v507_v38  ;;  %v534_v42 = vunpack.c.h.s8.bf16 (!%p1657_p8), %v2565_v18  ;;  %v533_v46 = vunpack.c.h.s8.bf16 (!%p1657_p8), %v507_v38  ;;  %v501_v49 = vld [vmem:[%s2536_s24 + $0x10] sm:$0xff] (!%p1657_p8)  ;;  %v504_v55 = vld [vmem:[%s2536_s24 + $0x28] sm:$0xff] (!%p1657_p8)  ;;  %v503_v61 = vld [vmem:[%s2536_s24 + $0x20] sm:$0xff] (!%p1657_p8) }
  0xa3   : > { %s460_s12 = sadd.s32 (!%p1657_p8), %s1658_s21, %s459_s16  ;;  %707 = vmatprep.mubr.bf16.mxu0 (!%p1657_p8), %v516_v19  ;;  %v520_v47 = vunpack.c.l.s8.bf16 (!%p1657_p8), %v502_v43  ;;  %v536_v48 = vunpack.c.l.s8.bf16 (!%p1657_p8), %v510_v44  ;;  %v509_v50 = vld [vmem:[%s2536_s24 + $0x50] sm:$0xff] (!%p1657_p8)  ;;  %v519_v51 = vunpack.c.l.s8.bf16 (!%p1657_p8), %v501_v49  ;;  %v522_v53 = vunpack.c.h.s8.bf16 (!%p1657_p8), %v502_v43  ;;  %v512_v56 = vld [vmem:[%s2536_s24 + $0x68] sm:$0xff] (!%p1657_p8)  ;;  %v511_v62 = vld [vmem:[%s2536_s24 + $0x60] sm:$0xff] (!%p1657_p8) }
  0xa4   : > { %771 = vmatprep.mubr.bf16.mxu1 (!%p1657_p8), %v532_v20  ;;  %s461_s8 = sld [smem:[#allocation5 + %s460_s12]] (!%p1657_p8)  ;;  %v535_v52 = vunpack.c.l.s8.bf16 (!%p1657_p8), %v509_v50  ;;  %v538_v54 = vunpack.c.h.s8.bf16 (!%p1657_p8), %v510_v44  ;;  %v521_v57 = vunpack.c.h.s8.bf16 (!%p1657_p8), %v501_v49  ;;  %v537_v58 = vunpack.c.h.s8.bf16 (!%p1657_p8), %v509_v50  ;;  %v506_v3 = vld [vmem:[%s2536_s24 + $0x38] sm:$0xff] (!%p1657_p8)  ;;  %v505_v9 = vld [vmem:[%s2536_s24 + $0x30] sm:$0xff] (!%p1657_p8)  ;;  %v547_v19 = vld [vmem:[#allocation2] sm:$0xff] (!%p1657_p8) }
  0xa5   : > { %v524_v59 = vunpack.c.l.s8.bf16 (!%p1657_p8), %v504_v55  ;;  %v540_v60 = vunpack.c.l.s8.bf16 (!%p1657_p8), %v512_v56  ;;  %v523_v63 = vunpack.c.l.s8.bf16 (!%p1657_p8), %v503_v61  ;;  %v539_v0 = vunpack.c.l.s8.bf16 (!%p1657_p8), %v511_v62  ;;  %v514_v4 = vld [vmem:[%s2536_s24 + $0x78] sm:$0xff] (!%p1657_p8)  ;;  %v513_v10 = vld [vmem:[%s2536_s24 + $0x70] sm:$0xff] (!%p1657_p8) }
  0xa6   : > { %v526_v1 = vunpack.c.h.s8.bf16 (!%p1657_p8), %v504_v55  ;;  %v542_v2 = vunpack.c.h.s8.bf16 (!%p1657_p8), %v512_v56  ;;  %v525_v5 = vunpack.c.h.s8.bf16 (!%p1657_p8), %v503_v61  ;;  %v541_v6 = vunpack.c.h.s8.bf16 (!%p1657_p8), %v511_v62  ;;  %v566_v49 = vld [vmem:[#allocation2 + $0x98] sm:$0xff] (!%p1657_p8)  ;;  %v567_v61 = vld [vmem:[#allocation2 + $0xa0] sm:$0xff] (!%p1657_p8) }
  0xa7   : > { %v528_v7 = vunpack.c.l.s8.bf16 (!%p1657_p8), %v506_v3  ;;  %v544_v8 = vunpack.c.l.s8.bf16 (!%p1657_p8), %v514_v4  ;;  %v527_v11 = vunpack.c.l.s8.bf16 (!%p1657_p8), %v505_v9  ;;  %v543_v12 = vunpack.c.l.s8.bf16 (!%p1657_p8), %v513_v10 }
  0xa8   : > { %v530_v13 = vunpack.c.h.s8.bf16 %v506_v3  ;;  %v546_v14 = vunpack.c.h.s8.bf16 %v514_v4  ;;  %v529_v15 = vunpack.c.h.s8.bf16 %v505_v9  ;;  %v545_v16 = vunpack.c.h.s8.bf16 %v513_v10  ;;  %v552_v3 = vld [vmem:[#allocation2 + $0x28] sm:$0xff] }
  0xaa   : > { %s1659_s23 = sshll.u32 %s461_s8, 8 }
  0xab   : > { %s463_s30 = sshra.s32 %s1659_s23, 3 }
  0xac   : > { %s1660_s22 = sshll.u32 %s463_s30, 2 }
  0xad   : > { %s2573_s5 = scalar_lea.vmem %s2823_s4, %s1660_s22 }
  0xae   : > { %v2081_v21 = vld [vmem:[%s2573_s5 + $0x40] sm:$0xff]   ;;  %v2083_v23 = vld [vmem:[%s2573_s5 + $0x48] sm:$0xff]   ;;  %v2085_v25 = vld [vmem:[%s2573_s5 + $0x50] sm:$0xff]  }
  0xaf   : > { %v2082_v22 = vld [vmem:[%s2573_s5] sm:$0xff]   ;;  %1849 = vmatprep.subr.bf16.mxu0 %v2081_v21  ;;  %1961 = vmatprep.subr.bf16.mxu1 %v2081_v21  ;;  %v2084_v24 = vld [vmem:[%s2573_s5 + $0x8] sm:$0xff]   ;;  %v2086_v26 = vld [vmem:[%s2573_s5 + $0x10] sm:$0xff]  }
  0xb0   : > { %1850 = vmatpush3.bf16.msra.mxu0 %v2082_v22  ;;  %1969 = vmatpush3.bf16.msra.mxu1 %v2082_v22  ;;  %v2087_v27 = vld [vmem:[%s2573_s5 + $0x58] sm:$0xff]   ;;  %v2089_v29 = vld [vmem:[%s2573_s5 + $0x60] sm:$0xff]   ;;  %v2091_v31 = vld [vmem:[%s2573_s5 + $0x68] sm:$0xff]  }
  0xb1   : > { %1851 = vmatprep.subr.bf16.mxu0 %v2083_v23  ;;  %1962 = vmatprep.subr.bf16.mxu1 %v2083_v23  ;;  %v2088_v28 = vld [vmem:[%s2573_s5 + $0x18] sm:$0xff]   ;;  %v2090_v30 = vld [vmem:[%s2573_s5 + $0x20] sm:$0xff]   ;;  %v2092_v32 = vld [vmem:[%s2573_s5 + $0x28] sm:$0xff]  }
  0xb2   : > { %v2093_v33 = vld [vmem:[%s2573_s5 + $0x70] sm:$0xff]   ;;  %v2095_v35 = vld [vmem:[%s2573_s5 + $0x78] sm:$0xff]   ;;  %v563_v21 = vld [vmem:[#allocation2 + $0x80] sm:$0xff] }
  0xb3   : > { %v2094_v34 = vld [vmem:[%s2573_s5 + $0x30] sm:$0xff]   ;;  %v2096_v36 = vld [vmem:[%s2573_s5 + $0x38] sm:$0xff]  }
  0xb4   : > { %1852 = vmatpush3.bf16.msra.mxu0 %v2084_v24  ;;  %1970 = vmatpush3.bf16.msra.mxu1 %v2084_v24 }
  0xb5   : > { %1853 = vmatprep.subr.bf16.mxu0 %v2085_v25  ;;  %1963 = vmatprep.subr.bf16.mxu1 %v2085_v25 }
  0xb8   : > { %1854 = vmatpush3.bf16.msra.mxu0 %v2086_v26  ;;  %1971 = vmatpush3.bf16.msra.mxu1 %v2086_v26 }
  0xb9   : > { %1855 = vmatprep.subr.bf16.mxu0 %v2087_v27  ;;  %1964 = vmatprep.subr.bf16.mxu1 %v2087_v27  ;;  %v548_v27 = vld [vmem:[#allocation2 + $0x8] sm:$0xff] }
  0xbc   : > { %1856 = vmatpush3.bf16.msra.mxu0 %v2088_v28  ;;  %1972 = vmatpush3.bf16.msra.mxu1 %v2088_v28 }
  0xbd   : > { %1857 = vmatprep.subr.bf16.mxu0 %v2089_v29  ;;  %1965 = vmatprep.subr.bf16.mxu1 %v2089_v29  ;;  %v564_v29 = vld [vmem:[#allocation2 + $0x88] sm:$0xff] }
  0xc0   : > { %1858 = vmatpush3.bf16.msra.mxu0 %v2090_v30  ;;  %1973 = vmatpush3.bf16.msra.mxu1 %v2090_v30 }
  0xc1   : > { %1859 = vmatprep.subr.bf16.mxu0 %v2091_v31  ;;  %1966 = vmatprep.subr.bf16.mxu1 %v2091_v31 }
  0xc4   : > { %1860 = vmatpush3.bf16.msra.mxu0 %v2092_v32  ;;  %1974 = vmatpush3.bf16.msra.mxu1 %v2092_v32 }
  0xc5   : > { %1861 = vmatprep.subr.bf16.mxu0 %v2093_v33  ;;  %1967 = vmatprep.subr.bf16.mxu1 %v2093_v33 }
  0xc8   : > { %1862 = vmatpush3.bf16.msra.mxu0 %v2094_v34  ;;  %1975 = vmatpush3.bf16.msra.mxu1 %v2094_v34 }
  0xc9   : > { %1863 = vmatprep.subr.bf16.mxu0 %v2095_v35  ;;  %1968 = vmatprep.subr.bf16.mxu1 %v2095_v35 }
  0xcc   : > { %1864 = vmatpush3.bf16.msra.mxu0 %v2096_v36  ;;  %1976 = vmatpush3.bf16.msra.mxu1 %v2096_v36 }
  0xcf   : > { %708 = vmatmul.mubr.bf16.vlgmr.msra.gmra.mrb[0].mxu0 %v515_v39  ;;  %772 = vmatmul.mubr.bf16.vlgmr.msra.gmra.mrb[0].mxu1 %v531_v40  ;;  %v549_v39 = vld [vmem:[#allocation2 + $0x10] sm:$0xff] }
  0xd0   : > { %715 = vmatprep.mubr.bf16.mxu0 %v518_v41  ;;  %779 = vmatprep.mubr.bf16.mxu1 %v534_v42  ;;  %v565_v41 = vld [vmem:[#allocation2 + $0x90] sm:$0xff] }
  0xd7   : > { %716 = vmatmul.mubr.bf16.gmra.mrb[4].mxu0 %v517_v45  ;;  %780 = vmatmul.mubr.bf16.gmra.mrb[4].mxu1 %v533_v46 }
  0xd8   : > { %723 = vmatprep.mubr.bf16.mxu0 %v520_v47  ;;  %787 = vmatprep.mubr.bf16.mxu1 %v536_v48  ;;  %v550_v47 = vld [vmem:[#allocation2 + $0x18] sm:$0xff] }
  0xdf   : > { %724 = vmatmul.mubr.bf16.gmra.mrb[8].mxu0 %v519_v51  ;;  %788 = vmatmul.mubr.bf16.gmra.mrb[8].mxu1 %v535_v52 }
  0xe0   : > { %731 = vmatprep.mubr.bf16.mxu0 %v522_v53  ;;  %795 = vmatprep.mubr.bf16.mxu1 %v538_v54 }
  0xe7   : > { %732 = vmatmul.mubr.bf16.gmra.mrb[12].mxu0 %v521_v57  ;;  %796 = vmatmul.mubr.bf16.gmra.mrb[12].mxu1 %v537_v58 }
  0xe8   : > { %739 = vmatprep.mubr.bf16.mxu0 %v524_v59  ;;  %803 = vmatprep.mubr.bf16.mxu1 %v540_v60  ;;  %v551_v59 = vld [vmem:[#allocation2 + $0x20] sm:$0xff] }
  0xef   : > { %740 = vmatmul.mubr.bf16.gmra.mrb[16].mxu0 %v523_v63  ;;  %804 = vmatmul.mubr.bf16.gmra.mrb[16].mxu1 %v539_v0 }
  0xf0   : > { %747 = vmatprep.mubr.bf16.mxu0 %v526_v1  ;;  %811 = vmatprep.mubr.bf16.mxu1 %v542_v2 }
  0xf7   : > { %748 = vmatmul.mubr.bf16.gmra.mrb[20].mxu0 %v525_v5  ;;  %812 = vmatmul.mubr.bf16.gmra.mrb[20].mxu1 %v541_v6  ;;  %v568_v5 = vld [vmem:[#allocation2 + $0xa8] sm:$0xff] }
  0xf8   : > { %755 = vmatprep.mubr.bf16.mxu0 %v528_v7  ;;  %819 = vmatprep.mubr.bf16.mxu1 %v544_v8 }
  0xff   : > { %756 = vmatmul.mubr.bf16.gmra.mrb[24].mxu0 %v527_v11  ;;  %820 = vmatmul.mubr.bf16.gmra.mrb[24].mxu1 %v543_v12 }
 0x100   : > { %763 = vmatprep.mubr.bf16.mxu0 %v530_v13  ;;  %827 = vmatprep.mubr.bf16.mxu1 %v546_v14 }
 0x107   : > { %764 = vmatmul.mubr.bf16.gmra.mrb[28].mxu0 %v529_v15  ;;  %828 = vmatmul.mubr.bf16.gmra.mrb[28].mxu1 %v545_v16  ;;  %v553_v15 = vld [vmem:[#allocation2 + $0x30] sm:$0xff] }
 0x1a2   : > { %v1865_v17 = vpop.f32.mrb[0].mxu0  ;;  %v1913_v18 = vpop.f32.mrb[0].mxu1 }
 0x1a3   : > { %v1866_v20 = vpop.f32.mrb[1].mxu0  ;;  %v1914_v22 = vpop.f32.mrb[1].mxu1 }
 0x1a4   : > { %v1867_v23 = vadd.f32 %v1866_v20, %v1865_v17  ;;  %v1915_v24 = vadd.f32 %v1914_v22, %v1913_v18  ;;  %v1868_v25 = vpop.f32.mrb[2].mxu0  ;;  %v1916_v26 = vpop.f32.mrb[2].mxu1  ;;  %v569_v17 = vld [vmem:[#allocation2 + $0xb0] sm:$0xff] }
 0x1a5   : > { %v1869_v28 = vpop.f32.mrb[3].mxu0  ;;  %v1917_v30 = vpop.f32.mrb[3].mxu1 }
 0x1a6   : > { %v836_v31 = vadd.f32 %v1867_v23, %v547_v19  ;;  %v852_v32 = vadd.f32 %v1915_v24, %v563_v21  ;;  %v1870_v33 = vadd.f32 %v1869_v28, %v1868_v25  ;;  %v1918_v34 = vadd.f32 %v1917_v30, %v1916_v26  ;;  %v554_v23 = vld [vmem:[#allocation2 + $0x38] sm:$0xff] }
 0x1a7   : > { %v570_v25 = vld [vmem:[#allocation2 + $0xb8] sm:$0xff] }
 0x1a8   : > { %868 = vst [vmem:[#allocation2] sm:$0xff] %v836_v31  ;;  %884 = vst [vmem:[#allocation2 + $0x80] sm:$0xff] %v852_v32  ;;  %v837_v35 = vadd.f32 %v1870_v33, %v548_v27  ;;  %v853_v36 = vadd.f32 %v1918_v34, %v564_v29 }
 0x1aa   : > { %869 = vst [vmem:[#allocation2 + $0x8] sm:$0xff] %v837_v35  ;;  %885 = vst [vmem:[#allocation2 + $0x88] sm:$0xff] %v853_v36  ;;  %v1871_v37 = vpop.f32.mrb[4].mxu0  ;;  %v1919_v38 = vpop.f32.mrb[4].mxu1  ;;  %v555_v35 = vld [vmem:[#allocation2 + $0x40] sm:$0xff] }
 0x1ab   : > { %v1872_v40 = vpop.f32.mrb[5].mxu0  ;;  %v1920_v42 = vpop.f32.mrb[5].mxu1 }
 0x1ac   : > { %v1873_v43 = vadd.f32 %v1872_v40, %v1871_v37  ;;  %v1921_v44 = vadd.f32 %v1920_v42, %v1919_v38  ;;  %v1874_v45 = vpop.f32.mrb[6].mxu0  ;;  %v1922_v46 = vpop.f32.mrb[6].mxu1  ;;  %v571_v37 = vld [vmem:[#allocation2 + $0xc0] sm:$0xff] }
 0x1ad   : > { %v1875_v48 = vpop.f32.mrb[7].mxu0  ;;  %v1923_v50 = vpop.f32.mrb[7].mxu1 }
 0x1ae   : > { %v838_v51 = vadd.f32 %v1873_v43, %v549_v39  ;;  %v854_v52 = vadd.f32 %v1921_v44, %v565_v41  ;;  %v1876_v53 = vadd.f32 %v1875_v48, %v1874_v45  ;;  %v1924_v54 = vadd.f32 %v1923_v50, %v1922_v46  ;;  %v556_v43 = vld [vmem:[#allocation2 + $0x48] sm:$0xff] }
 0x1af   : > { %v572_v45 = vld [vmem:[#allocation2 + $0xc8] sm:$0xff] }
 0x1b0   : > { %870 = vst [vmem:[#allocation2 + $0x10] sm:$0xff] %v838_v51  ;;  %886 = vst [vmem:[#allocation2 + $0x90] sm:$0xff] %v854_v52  ;;  %v839_v55 = vadd.f32 %v1876_v53, %v550_v47  ;;  %v855_v56 = vadd.f32 %v1924_v54, %v566_v49 }
 0x1b2   : > { %871 = vst [vmem:[#allocation2 + $0x18] sm:$0xff] %v839_v55  ;;  %887 = vst [vmem:[#allocation2 + $0x98] sm:$0xff] %v855_v56  ;;  %v1877_v57 = vpop.f32.mrb[8].mxu0  ;;  %v1925_v58 = vpop.f32.mrb[8].mxu1  ;;  %v557_v55 = vld [vmem:[#allocation2 + $0x50] sm:$0xff] }
 0x1b3   : > { %v1878_v60 = vpop.f32.mrb[9].mxu0  ;;  %v1926_v62 = vpop.f32.mrb[9].mxu1 }
 0x1b4   : > { %v1879_v63 = vadd.f32 %v1878_v60, %v1877_v57  ;;  %v1927_v0 = vadd.f32 %v1926_v62, %v1925_v58  ;;  %v1880_v1 = vpop.f32.mrb[10].mxu0  ;;  %v1928_v2 = vpop.f32.mrb[10].mxu1  ;;  %v573_v57 = vld [vmem:[#allocation2 + $0xd0] sm:$0xff] }
 0x1b5   : > { %v1881_v4 = vpop.f32.mrb[11].mxu0  ;;  %v1929_v6 = vpop.f32.mrb[11].mxu1 }
 0x1b6   : > { %v840_v7 = vadd.f32 %v1879_v63, %v551_v59  ;;  %v856_v8 = vadd.f32 %v1927_v0, %v567_v61  ;;  %v1882_v9 = vadd.f32 %v1881_v4, %v1880_v1  ;;  %v1930_v10 = vadd.f32 %v1929_v6, %v1928_v2  ;;  %v558_v63 = vld [vmem:[#allocation2 + $0x58] sm:$0xff] }
 0x1b7   : > { %v574_v1 = vld [vmem:[#allocation2 + $0xd8] sm:$0xff] }
 0x1b8   : > { %872 = vst [vmem:[#allocation2 + $0x20] sm:$0xff] %v840_v7  ;;  %888 = vst [vmem:[#allocation2 + $0xa0] sm:$0xff] %v856_v8  ;;  %v841_v11 = vadd.f32 %v1882_v9, %v552_v3  ;;  %v857_v12 = vadd.f32 %v1930_v10, %v568_v5 }
 0x1ba   : > { %873 = vst [vmem:[#allocation2 + $0x28] sm:$0xff] %v841_v11  ;;  %889 = vst [vmem:[#allocation2 + $0xa8] sm:$0xff] %v857_v12  ;;  %v1883_v13 = vpop.f32.mrb[12].mxu0  ;;  %v1931_v14 = vpop.f32.mrb[12].mxu1  ;;  %v559_v11 = vld [vmem:[#allocation2 + $0x60] sm:$0xff] }
 0x1bb   : > { %v1884_v16 = vpop.f32.mrb[13].mxu0  ;;  %v1932_v18 = vpop.f32.mrb[13].mxu1 }
 0x1bc   : > { %v1885_v19 = vadd.f32 %v1884_v16, %v1883_v13  ;;  %v1933_v20 = vadd.f32 %v1932_v18, %v1931_v14  ;;  %v1886_v21 = vpop.f32.mrb[14].mxu0  ;;  %v1934_v22 = vpop.f32.mrb[14].mxu1  ;;  %v575_v13 = vld [vmem:[#allocation2 + $0xe0] sm:$0xff] }
 0x1bd   : > { %v1887_v24 = vpop.f32.mrb[15].mxu0  ;;  %v1935_v26 = vpop.f32.mrb[15].mxu1 }
 0x1be   : > { %v842_v27 = vadd.f32 %v1885_v19, %v553_v15  ;;  %v858_v28 = vadd.f32 %v1933_v20, %v569_v17  ;;  %v1888_v29 = vadd.f32 %v1887_v24, %v1886_v21  ;;  %v1936_v30 = vadd.f32 %v1935_v26, %v1934_v22  ;;  %v560_v19 = vld [vmem:[#allocation2 + $0x68] sm:$0xff] }
 0x1bf   : > { %v576_v21 = vld [vmem:[#allocation2 + $0xe8] sm:$0xff] }
 0x1c0   : > { %874 = vst [vmem:[#allocation2 + $0x30] sm:$0xff] %v842_v27  ;;  %890 = vst [vmem:[#allocation2 + $0xb0] sm:$0xff] %v858_v28  ;;  %v843_v31 = vadd.f32 %v1888_v29, %v554_v23  ;;  %v859_v32 = vadd.f32 %v1936_v30, %v570_v25 }
 0x1c2   : > { %875 = vst [vmem:[#allocation2 + $0x38] sm:$0xff] %v843_v31  ;;  %891 = vst [vmem:[#allocation2 + $0xb8] sm:$0xff] %v859_v32  ;;  %v1889_v33 = vpop.f32.mrb[16].mxu0  ;;  %v1937_v34 = vpop.f32.mrb[16].mxu1  ;;  %v561_v31 = vld [vmem:[#allocation2 + $0x70] sm:$0xff] }
 0x1c3   : > { %v1890_v36 = vpop.f32.mrb[17].mxu0  ;;  %v1938_v38 = vpop.f32.mrb[17].mxu1 }
 0x1c4   : > { %v1891_v39 = vadd.f32 %v1890_v36, %v1889_v33  ;;  %v1939_v40 = vadd.f32 %v1938_v38, %v1937_v34  ;;  %v1892_v41 = vpop.f32.mrb[18].mxu0  ;;  %v1940_v42 = vpop.f32.mrb[18].mxu1  ;;  %v577_v33 = vld [vmem:[#allocation2 + $0xf0] sm:$0xff] }
 0x1c5   : > { %v1893_v44 = vpop.f32.mrb[19].mxu0  ;;  %v1941_v46 = vpop.f32.mrb[19].mxu1 }
 0x1c6   : > { %v844_v47 = vadd.f32 %v1891_v39, %v555_v35  ;;  %v860_v48 = vadd.f32 %v1939_v40, %v571_v37  ;;  %v1894_v49 = vadd.f32 %v1893_v44, %v1892_v41  ;;  %v1942_v50 = vadd.f32 %v1941_v46, %v1940_v42  ;;  %v562_v39 = vld [vmem:[#allocation2 + $0x78] sm:$0xff] }
 0x1c7   : > { %v578_v41 = vld [vmem:[#allocation2 + $0xf8] sm:$0xff] }
 0x1c8   : > { %876 = vst [vmem:[#allocation2 + $0x40] sm:$0xff] %v844_v47  ;;  %892 = vst [vmem:[#allocation2 + $0xc0] sm:$0xff] %v860_v48  ;;  %v845_v51 = vadd.f32 %v1894_v49, %v556_v43  ;;  %v861_v52 = vadd.f32 %v1942_v50, %v572_v45 }
 0x1ca   : > { %877 = vst [vmem:[#allocation2 + $0x48] sm:$0xff] %v845_v51  ;;  %893 = vst [vmem:[#allocation2 + $0xc8] sm:$0xff] %v861_v52  ;;  %v1895_v53 = vpop.f32.mrb[20].mxu0  ;;  %v1943_v54 = vpop.f32.mrb[20].mxu1 }
 0x1cb   : > { %v1896_v56 = vpop.f32.mrb[21].mxu0  ;;  %v1944_v58 = vpop.f32.mrb[21].mxu1 }
 0x1cc   : > { %v1897_v59 = vadd.f32 %v1896_v56, %v1895_v53  ;;  %v1945_v60 = vadd.f32 %v1944_v58, %v1943_v54  ;;  %v1898_v61 = vpop.f32.mrb[22].mxu0  ;;  %v1946_v62 = vpop.f32.mrb[22].mxu1 }
 0x1cd   : > { %v1899_v0 = vpop.f32.mrb[23].mxu0  ;;  %v1947_v2 = vpop.f32.mrb[23].mxu1 }
 0x1ce   : > { %v846_v3 = vadd.f32 %v1897_v59, %v557_v55  ;;  %v862_v4 = vadd.f32 %v1945_v60, %v573_v57  ;;  %v1900_v5 = vadd.f32 %v1899_v0, %v1898_v61  ;;  %v1948_v6 = vadd.f32 %v1947_v2, %v1946_v62 }
 0x1d0   : > { %878 = vst [vmem:[#allocation2 + $0x50] sm:$0xff] %v846_v3  ;;  %894 = vst [vmem:[#allocation2 + $0xd0] sm:$0xff] %v862_v4  ;;  %v847_v7 = vadd.f32 %v1900_v5, %v558_v63  ;;  %v863_v8 = vadd.f32 %v1948_v6, %v574_v1 }
 0x1d2   : > { %879 = vst [vmem:[#allocation2 + $0x58] sm:$0xff] %v847_v7  ;;  %895 = vst [vmem:[#allocation2 + $0xd8] sm:$0xff] %v863_v8  ;;  %v1901_v9 = vpop.f32.mrb[24].mxu0  ;;  %v1949_v10 = vpop.f32.mrb[24].mxu1 }
 0x1d3   : > { %v1902_v12 = vpop.f32.mrb[25].mxu0  ;;  %v1950_v14 = vpop.f32.mrb[25].mxu1 }
 0x1d4   : > { %v1903_v15 = vadd.f32 %v1902_v12, %v1901_v9  ;;  %v1951_v16 = vadd.f32 %v1950_v14, %v1949_v10  ;;  %v1904_v17 = vpop.f32.mrb[26].mxu0  ;;  %v1952_v18 = vpop.f32.mrb[26].mxu1 }
 0x1d5   : > { %v1905_v20 = vpop.f32.mrb[27].mxu0  ;;  %v1953_v22 = vpop.f32.mrb[27].mxu1 }
 0x1d6   : > { %v848_v23 = vadd.f32 %v1903_v15, %v559_v11  ;;  %v864_v24 = vadd.f32 %v1951_v16, %v575_v13  ;;  %v1906_v25 = vadd.f32 %v1905_v20, %v1904_v17  ;;  %v1954_v26 = vadd.f32 %v1953_v22, %v1952_v18 }
 0x1d8   : > { %880 = vst [vmem:[#allocation2 + $0x60] sm:$0xff] %v848_v23  ;;  %896 = vst [vmem:[#allocation2 + $0xe0] sm:$0xff] %v864_v24  ;;  %v849_v27 = vadd.f32 %v1906_v25, %v560_v19  ;;  %v865_v28 = vadd.f32 %v1954_v26, %v576_v21 }
 0x1da   : > { %881 = vst [vmem:[#allocation2 + $0x68] sm:$0xff] %v849_v27  ;;  %897 = vst [vmem:[#allocation2 + $0xe8] sm:$0xff] %v865_v28  ;;  %v1907_v29 = vpop.f32.mrb[28].mxu0  ;;  %v1955_v30 = vpop.f32.mrb[28].mxu1 }
 0x1db   : > { %v1908_v32 = vpop.f32.mrb[29].mxu0  ;;  %v1956_v34 = vpop.f32.mrb[29].mxu1 }
 0x1dc   : > { %v1909_v35 = vadd.f32 %v1908_v32, %v1907_v29  ;;  %v1957_v36 = vadd.f32 %v1956_v34, %v1955_v30  ;;  %v1910_v37 = vpop.f32.mrb[30].mxu0  ;;  %v1958_v38 = vpop.f32.mrb[30].mxu1 }
 0x1dd   : > { %v1911_v40 = vpop.f32.mrb[31].mxu0  ;;  %v1959_v42 = vpop.f32.mrb[31].mxu1 }
 0x1de   : > { %v850_v43 = vadd.f32 %v1909_v35, %v561_v31  ;;  %v866_v44 = vadd.f32 %v1957_v36, %v577_v33  ;;  %v1912_v45 = vadd.f32 %v1911_v40, %v1910_v37  ;;  %v1960_v46 = vadd.f32 %v1959_v42, %v1958_v38 }
 0x1e0   : > { %882 = vst [vmem:[#allocation2 + $0x70] sm:$0xff] %v850_v43  ;;  %898 = vst [vmem:[#allocation2 + $0xf0] sm:$0xff] %v866_v44  ;;  %v851_v47 = vadd.f32 %v1912_v45, %v562_v39  ;;  %v867_v48 = vadd.f32 %v1960_v46, %v578_v41 }
 0x1e2   : > { %883 = vst [vmem:[#allocation2 + $0x78] sm:$0xff] %v851_v47  ;;  %899 = vst [vmem:[#allocation2 + $0xf8] sm:$0xff] %v867_v48 }
 0x1e3 PF: > { %p1677_p11 = scmp.ne.s32.totalorder %s2283_s14, 1 }
 0x1e4   : > { %v906_v49 = vld [vmem:[%s2550_s0 + $0x10] sm:$0xff] (!%p1677_p11)  ;;  %v904_v50 = vld [vmem:[%s2550_s0] sm:$0xff] (!%p1677_p11)  ;;  %v2307_v51 = vmov (!%p1677_p11), 0   ;;  %v907_v52 = vld [vmem:[%s2550_s0 + $0x18] sm:$0xff] (!%p1677_p11) }
 0x1e5   : > { %903 = sbr.rel (%p1677_p11) target bundleno = 681 (0x2a9), region = 75  ;;  %2098 = vset.pattern.permute.xlu1 (!%p1677_p11), %v2307_v51  ;;  %2097 = vset.pattern.permute.xlu0 (!%p1677_p11), %v2307_v51  ;;  %v905_v53 = vld [vmem:[%s2550_s0 + $0x8] sm:$0xff] (!%p1677_p11)  ;;  %v908_v55 = vld [vmem:[%s2550_s0 + $0x20] sm:$0xff] (!%p1677_p11)  ;;  %v911_v56 = vld [vmem:[%s2550_s0 + $0x38] sm:$0xff] (!%p1677_p11) }
 0x1e6   : > { %980 = vperm.xlu1 (!%p1677_p11), %2098, %v906_v49   ;;  %970 = vperm.xlu0 (!%p1677_p11), %2097, %v904_v50   ;;  %v909_v54 = vld [vmem:[%s2550_s0 + $0x28] sm:$0xff] (!%p1677_p11)  ;;  %v910_v57 = vld [vmem:[%s2550_s0 + $0x30] sm:$0xff] (!%p1677_p11)  ;;  %v912_v59 = vld [vmem:[%s2550_s0 + $0x40] sm:$0xff] (!%p1677_p11) }
 0x1e7   : > { %v913_v58 = vld [vmem:[%s2550_s0 + $0x48] sm:$0xff] (!%p1677_p11)  ;;  %v915_v60 = vld [vmem:[%s2550_s0 + $0x58] sm:$0xff] (!%p1677_p11)  ;;  %v914_v61 = vld [vmem:[%s2550_s0 + $0x50] sm:$0xff] (!%p1677_p11) }
 0x1e8   : > { %v917_v62 = vld [vmem:[%s2550_s0 + $0x68] sm:$0xff] (!%p1677_p11)  ;;  %v916_v63 = vld [vmem:[%s2550_s0 + $0x60] sm:$0xff] (!%p1677_p11)  ;;  %v919_v0 = vld [vmem:[%s2550_s0 + $0x78] sm:$0xff] (!%p1677_p11) }
 0x1e9   : > { %v918_v1 = vld [vmem:[%s2550_s0 + $0x70] sm:$0xff] (!%p1677_p11)  ;;  %v921_v2 = vld [vmem:[%s2550_s0 + $0x88] sm:$0xff] (!%p1677_p11)  ;;  %v920_v3 = vld [vmem:[%s2550_s0 + $0x80] sm:$0xff] (!%p1677_p11) }
 0x1ea   : > { %985 = vperm.xlu1 (!%p1677_p11), %2098, %v907_v52   ;;  %975 = vperm.xlu0 (!%p1677_p11), %2097, %v905_v53   ;;  %v923_v4 = vld [vmem:[%s2550_s0 + $0x98] sm:$0xff] (!%p1677_p11)  ;;  %v922_v5 = vld [vmem:[%s2550_s0 + $0x90] sm:$0xff] (!%p1677_p11)  ;;  %v925_v6 = vld [vmem:[%s2550_s0 + $0xa8] sm:$0xff] (!%p1677_p11) }
 0x1eb   : > { %v924_v7 = vld [vmem:[%s2550_s0 + $0xa0] sm:$0xff] (!%p1677_p11)  ;;  %v927_v8 = vld [vmem:[%s2550_s0 + $0xb8] sm:$0xff] (!%p1677_p11)  ;;  %v926_v9 = vld [vmem:[%s2550_s0 + $0xb0] sm:$0xff] (!%p1677_p11) }
 0x1ec   : > { %v929_v10 = vld [vmem:[%s2550_s0 + $0xc8] sm:$0xff]  ;;  %v928_v11 = vld [vmem:[%s2550_s0 + $0xc0] sm:$0xff]  ;;  %v931_v12 = vld [vmem:[%s2550_s0 + $0xd8] sm:$0xff] }
 0x1ed   : > { %v930_v13 = vld [vmem:[%s2550_s0 + $0xd0] sm:$0xff]  ;;  %v933_v14 = vld [vmem:[%s2550_s0 + $0xe8] sm:$0xff]  ;;  %v932_v15 = vld [vmem:[%s2550_s0 + $0xe0] sm:$0xff] }
 0x1ee   : > { %995 = vperm.xlu1 %2098, %v909_v54   ;;  %990 = vperm.xlu0 %2097, %v908_v55   ;;  %v935_v16 = vld [vmem:[%s2550_s0 + $0xf8] sm:$0xff]  ;;  %v934_v17 = vld [vmem:[%s2550_s0 + $0xf0] sm:$0xff]  ;;  %v936_v19 = vld [vmem:[#allocation2] sm:$0xff] }
 0x1ef   : > { %v938_v18 = vld [vmem:[#allocation2 + $0x10] sm:$0xff]  ;;  %v1160_v22 = vld [vmem:[%s2539_s9] sm:$0xff]  ;;  %v939_v26 = vld [vmem:[#allocation2 + $0x18] sm:$0xff] }
 0x1f0   : > { %v1162_v20 = vld [vmem:[%s2539_s9 + $0x10] sm:$0xff]  ;;  %v937_v27 = vld [vmem:[#allocation2 + $0x8] sm:$0xff]  ;;  %v1163_v30 = vld [vmem:[%s2539_s9 + $0x18] sm:$0xff] }
 0x1f1   : > { %v1161_v32 = vld [vmem:[%s2539_s9 + $0x8] sm:$0xff]  ;;  %v940_v39 = vld [vmem:[#allocation2 + $0x20] sm:$0xff]  ;;  %v943_v52 = vld [vmem:[#allocation2 + $0x38] sm:$0xff] }
 0x1f2   : > { %1005 = vperm.xlu1 %2098, %v911_v56   ;;  %1000 = vperm.xlu0 %2097, %v910_v57   ;;  %v941_v38 = vld [vmem:[#allocation2 + $0x28] sm:$0xff]  ;;  %v1164_v46 = vld [vmem:[%s2539_s9 + $0x20] sm:$0xff]  ;;  %v942_v53 = vld [vmem:[#allocation2 + $0x30] sm:$0xff] }
 0x1f3   : > { %v1165_v44 = vld [vmem:[%s2539_s9 + $0x28] sm:$0xff] }
 0x1f6   : > { %1015 = vperm.xlu1 %2098, %v913_v58   ;;  %1010 = vperm.xlu0 %2097, %v912_v59   ;;  %v1167_v58 = vld [vmem:[%s2539_s9 + $0x38] sm:$0xff] }
 0x1fa   : > { %1025 = vperm.xlu1 %2098, %v915_v60   ;;  %1020 = vperm.xlu0 %2097, %v914_v61   ;;  %v1166_v60 = vld [vmem:[%s2539_s9 + $0x30] sm:$0xff] }
 0x1fe   : > { %1035 = vperm.xlu1 %2098, %v917_v62   ;;  %1030 = vperm.xlu0 %2097, %v916_v63  }
 0x202   : > { %1045 = vperm.xlu1 %2098, %v919_v0   ;;  %1040 = vperm.xlu0 %2097, %v918_v1   ;;  %v945_v1 = vld [vmem:[#allocation2 + $0x48] sm:$0xff] }
 0x206   : > { %1055 = vperm.xlu1 %2098, %v921_v2   ;;  %1050 = vperm.xlu0 %2097, %v920_v3   ;;  %v944_v2 = vld [vmem:[#allocation2 + $0x40] sm:$0xff] }
 0x20a   : > { %1065 = vperm.xlu1 %2098, %v923_v4   ;;  %1060 = vperm.xlu0 %2097, %v922_v5  }
 0x20e   : > { %1075 = vperm.xlu1 %2098, %v925_v6   ;;  %1070 = vperm.xlu0 %2097, %v924_v7   ;;  %v1169_v7 = vld [vmem:[%s2539_s9 + $0x48] sm:$0xff] }
 0x212   : > { %1085 = vperm.xlu1 %2098, %v927_v8   ;;  %1080 = vperm.xlu0 %2097, %v926_v9   ;;  %v1168_v9 = vld [vmem:[%s2539_s9 + $0x40] sm:$0xff] }
 0x216   : > { %1095 = vperm.xlu1 %2098, %v929_v10   ;;  %1090 = vperm.xlu0 %2097, %v928_v11  }
 0x21a   : > { %1105 = vperm.xlu1 %2098, %v931_v12   ;;  %1100 = vperm.xlu0 %2097, %v930_v13  }
 0x21e   : > { %1115 = vperm.xlu1 %2098, %v933_v14   ;;  %1110 = vperm.xlu0 %2097, %v932_v15   ;;  %v947_v14 = vld [vmem:[#allocation2 + $0x58] sm:$0xff]  ;;  %v946_v15 = vld [vmem:[#allocation2 + $0x50] sm:$0xff] }
 0x222   : > { %1125 = vperm.xlu1 %2098, %v935_v16   ;;  %1120 = vperm.xlu0 %2097, %v934_v17  }
 0x265   : > { %v981_v21 = vpop.permute.xlu1 %980  ;;  %v971_v23 = vpop.permute.xlu0 %970 }
 0x266   : > { %v1130_v24 = vmul.f32 %v981_v21, %v938_v18  ;;  %v1128_v25 = vmul.f32 %v971_v23, %v936_v19 }
 0x268   : > { %v1194_v28 = vadd.f32 %v1162_v20, %v1130_v24  ;;  %v1192_v29 = vadd.f32 %v1160_v22, %v1128_v25  ;;  %v1258_v36 = vmul.f32 %v1130_v24, %v981_v21  ;;  %v1256_v37 = vmul.f32 %v1128_v25, %v971_v23  ;;  %v1171_v20 = vld [vmem:[%s2539_s9 + $0x58] sm:$0xff]  ;;  %v1170_v22 = vld [vmem:[%s2539_s9 + $0x50] sm:$0xff] }
 0x269   : > { %v986_v31 = vpop.permute.xlu1 %985  ;;  %v976_v33 = vpop.permute.xlu0 %975 }
 0x26a   : > { %1226 = vst [vmem:[%s2554_s19 + $0x10] sm:$0xff] %v1194_v28  ;;  %1224 = vst [vmem:[%s2554_s19] sm:$0xff] %v1192_v29  ;;  %v1131_v34 = vmul.f32 %v986_v31, %v939_v26  ;;  %v1129_v35 = vmul.f32 %v976_v33, %v937_v27  ;;  %v949_v27 = vld [vmem:[#allocation2 + $0x68] sm:$0xff]  ;;  %v948_v28 = vld [vmem:[#allocation2 + $0x60] sm:$0xff] }
 0x26c   : > { %v1195_v40 = vadd.f32 %v1163_v30, %v1131_v34  ;;  %v1259_v41 = vmul.f32 %v1131_v34, %v986_v31  ;;  %v1193_v42 = vadd.f32 %v1161_v32, %v1129_v35  ;;  %v1257_v43 = vmul.f32 %v1129_v35, %v976_v33  ;;  %v1173_v33 = vld [vmem:[%s2539_s9 + $0x68] sm:$0xff]  ;;  %v1172_v35 = vld [vmem:[%s2539_s9 + $0x60] sm:$0xff] }
 0x26d   : > { %v996_v45 = vpop.permute.xlu1 %995  ;;  %v991_v47 = vpop.permute.xlu0 %990 }
 0x26e   : > { %1227 = vst [vmem:[%s2554_s19 + $0x18] sm:$0xff] %v1195_v40  ;;  %v1762_v48 = vpack.c.bf16 %v1259_v41, %v1258_v36  ;;  %1225 = vst [vmem:[%s2554_s19 + $0x8] sm:$0xff] %v1193_v42  ;;  %v1757_v49 = vpack.c.bf16 %v1257_v43, %v1256_v37  ;;  %v1133_v50 = vmul.f32 %v996_v45, %v941_v38  ;;  %v951_v40 = vld [vmem:[#allocation2 + $0x78] sm:$0xff]  ;;  %v950_v41 = vld [vmem:[#allocation2 + $0x70] sm:$0xff] }
 0x26f   : > { %v1132_v51 = vmul.f32 %v991_v47, %v940_v39 }
 0x270   : > { %1834 = vst [vmem:[%s2552_s27 + $0x8] sm:$0xff] %v1762_v48   ;;  %1758 = vst [vmem:[%s2552_s27] sm:$0xff] %v1757_v49   ;;  %v1197_v54 = vadd.f32 %v1165_v44, %v1133_v50  ;;  %v1261_v55 = vmul.f32 %v1133_v50, %v996_v45  ;;  %v1174_v48 = vld [vmem:[%s2539_s9 + $0x70] sm:$0xff] }
 0x271   : > { %v1196_v56 = vadd.f32 %v1164_v46, %v1132_v51  ;;  %v1260_v57 = vmul.f32 %v1132_v51, %v991_v47  ;;  %v1006_v59 = vpop.permute.xlu1 %1005  ;;  %v1001_v61 = vpop.permute.xlu0 %1000  ;;  %v1175_v46 = vld [vmem:[%s2539_s9 + $0x78] sm:$0xff] }
 0x272   : > { %1229 = vst [vmem:[%s2554_s19 + $0x28] sm:$0xff] %v1197_v54  ;;  %v1135_v63 = vmul.f32 %v1006_v59, %v943_v52  ;;  %v1134_v0 = vmul.f32 %v1001_v61, %v942_v53  ;;  %v953_v53 = vld [vmem:[#allocation2 + $0x88] sm:$0xff]  ;;  %v952_v54 = vld [vmem:[#allocation2 + $0x80] sm:$0xff] }
 0x273   : > { %1228 = vst [vmem:[%s2554_s19 + $0x20] sm:$0xff] %v1196_v56  ;;  %v1767_v62 = vpack.c.bf16 %v1261_v55, %v1260_v57 }
 0x274   : > { %v1199_v3 = vadd.f32 %v1167_v58, %v1135_v63  ;;  %v1263_v4 = vmul.f32 %v1135_v63, %v1006_v59  ;;  %v1198_v5 = vadd.f32 %v1166_v60, %v1134_v0  ;;  %v1262_v6 = vmul.f32 %v1134_v0, %v1001_v61  ;;  %v1177_v59 = vld [vmem:[%s2539_s9 + $0x88] sm:$0xff]  ;;  %v1176_v61 = vld [vmem:[%s2539_s9 + $0x80] sm:$0xff] }
 0x275   : > { %1835 = vst [vmem:[%s2552_s27 + $0x10] sm:$0xff] %v1767_v62   ;;  %v1016_v8 = vpop.permute.xlu1 %1015  ;;  %v1011_v10 = vpop.permute.xlu0 %1010 }
 0x276   : > { %1231 = vst [vmem:[%s2554_s19 + $0x38] sm:$0xff] %v1199_v3  ;;  %1230 = vst [vmem:[%s2554_s19 + $0x30] sm:$0xff] %v1198_v5  ;;  %v1772_v11 = vpack.c.bf16 %v1263_v4, %v1262_v6  ;;  %v1137_v12 = vmul.f32 %v1016_v8, %v945_v1  ;;  %v1136_v13 = vmul.f32 %v1011_v10, %v944_v2  ;;  %v955_v2 = vld [vmem:[#allocation2 + $0x98] sm:$0xff]  ;;  %v954_v3 = vld [vmem:[#allocation2 + $0x90] sm:$0xff] }
 0x278   : > { %1836 = vst [vmem:[%s2552_s27 + $0x18] sm:$0xff] %v1772_v11   ;;  %v1201_v16 = vadd.f32 %v1169_v7, %v1137_v12  ;;  %v1265_v17 = vmul.f32 %v1137_v12, %v1016_v8  ;;  %v1200_v18 = vadd.f32 %v1168_v9, %v1136_v13  ;;  %v1264_v19 = vmul.f32 %v1136_v13, %v1011_v10  ;;  %v1179_v8 = vld [vmem:[%s2539_s9 + $0x98] sm:$0xff]  ;;  %v1178_v10 = vld [vmem:[%s2539_s9 + $0x90] sm:$0xff] }
 0x279   : > { %v1026_v21 = vpop.permute.xlu1 %1025  ;;  %v1021_v23 = vpop.permute.xlu0 %1020 }
 0x27a   : > { %1233 = vst [vmem:[%s2554_s19 + $0x48] sm:$0xff] %v1201_v16  ;;  %1232 = vst [vmem:[%s2554_s19 + $0x40] sm:$0xff] %v1200_v18  ;;  %v1777_v24 = vpack.c.bf16 %v1265_v17, %v1264_v19  ;;  %v1139_v25 = vmul.f32 %v1026_v21, %v947_v14  ;;  %v1138_v26 = vmul.f32 %v1021_v23, %v946_v15  ;;  %v957_v15 = vld [vmem:[#allocation2 + $0xa8] sm:$0xff]  ;;  %v956_v16 = vld [vmem:[#allocation2 + $0xa0] sm:$0xff] }
 0x27c   : > { %1837 = vst [vmem:[%s2552_s27 + $0x20] sm:$0xff] %v1777_v24   ;;  %v1203_v29 = vadd.f32 %v1171_v20, %v1139_v25  ;;  %v1267_v30 = vmul.f32 %v1139_v25, %v1026_v21  ;;  %v1202_v31 = vadd.f32 %v1170_v22, %v1138_v26  ;;  %v1266_v32 = vmul.f32 %v1138_v26, %v1021_v23  ;;  %v1181_v21 = vld [vmem:[%s2539_s9 + $0xa8] sm:$0xff]  ;;  %v1180_v23 = vld [vmem:[%s2539_s9 + $0xa0] sm:$0xff] }
 0x27d   : > { %v1036_v34 = vpop.permute.xlu1 %1035  ;;  %v1031_v36 = vpop.permute.xlu0 %1030 }
 0x27e   : > { %1235 = vst [vmem:[%s2554_s19 + $0x58] sm:$0xff] %v1203_v29  ;;  %1234 = vst [vmem:[%s2554_s19 + $0x50] sm:$0xff] %v1202_v31  ;;  %v1782_v37 = vpack.c.bf16 %v1267_v30, %v1266_v32  ;;  %v1141_v38 = vmul.f32 %v1036_v34, %v949_v27  ;;  %v1140_v39 = vmul.f32 %v1031_v36, %v948_v28  ;;  %v959_v28 = vld [vmem:[#allocation2 + $0xb8] sm:$0xff]  ;;  %v958_v29 = vld [vmem:[#allocation2 + $0xb0] sm:$0xff] }
 0x280   : > { %1838 = vst [vmem:[%s2552_s27 + $0x28] sm:$0xff] %v1782_v37   ;;  %v1205_v42 = vadd.f32 %v1173_v33, %v1141_v38  ;;  %v1269_v43 = vmul.f32 %v1141_v38, %v1036_v34  ;;  %v1204_v44 = vadd.f32 %v1172_v35, %v1140_v39  ;;  %v1268_v45 = vmul.f32 %v1140_v39, %v1031_v36  ;;  %v1183_v34 = vld [vmem:[%s2539_s9 + $0xb8] sm:$0xff]  ;;  %v1182_v36 = vld [vmem:[%s2539_s9 + $0xb0] sm:$0xff] }
 0x281   : > { %v1046_v47 = vpop.permute.xlu1 %1045  ;;  %v1041_v49 = vpop.permute.xlu0 %1040 }
 0x282   : > { %1237 = vst [vmem:[%s2554_s19 + $0x68] sm:$0xff] %v1205_v42  ;;  %1236 = vst [vmem:[%s2554_s19 + $0x60] sm:$0xff] %v1204_v44  ;;  %v1787_v50 = vpack.c.bf16 %v1269_v43, %v1268_v45  ;;  %v1143_v51 = vmul.f32 %v1046_v47, %v951_v40  ;;  %v1142_v52 = vmul.f32 %v1041_v49, %v950_v41  ;;  %v961_v41 = vld [vmem:[#allocation2 + $0xc8] sm:$0xff]  ;;  %v960_v42 = vld [vmem:[#allocation2 + $0xc0] sm:$0xff] }
 0x284   : > { %1839 = vst [vmem:[%s2552_s27 + $0x30] sm:$0xff] %v1787_v50   ;;  %v1207_v55 = vadd.f32 %v1175_v46, %v1143_v51  ;;  %v1271_v56 = vmul.f32 %v1143_v51, %v1046_v47  ;;  %v1206_v57 = vadd.f32 %v1174_v48, %v1142_v52  ;;  %v1270_v58 = vmul.f32 %v1142_v52, %v1041_v49  ;;  %v1185_v47 = vld [vmem:[%s2539_s9 + $0xc8] sm:$0xff]  ;;  %v1184_v49 = vld [vmem:[%s2539_s9 + $0xc0] sm:$0xff] }
 0x285   : > { %v1056_v60 = vpop.permute.xlu1 %1055  ;;  %v1051_v62 = vpop.permute.xlu0 %1050 }
 0x286   : > { %1239 = vst [vmem:[%s2554_s19 + $0x78] sm:$0xff] %v1207_v55  ;;  %1238 = vst [vmem:[%s2554_s19 + $0x70] sm:$0xff] %v1206_v57  ;;  %v1792_v63 = vpack.c.bf16 %v1271_v56, %v1270_v58  ;;  %v1145_v0 = vmul.f32 %v1056_v60, %v953_v53  ;;  %v1144_v1 = vmul.f32 %v1051_v62, %v952_v54  ;;  %v963_v54 = vld [vmem:[#allocation2 + $0xd8] sm:$0xff]  ;;  %v962_v55 = vld [vmem:[#allocation2 + $0xd0] sm:$0xff] }
 0x288   : > { %1840 = vst [vmem:[%s2552_s27 + $0x38] sm:$0xff] %v1792_v63   ;;  %v1209_v4 = vadd.f32 %v1177_v59, %v1145_v0  ;;  %v1273_v5 = vmul.f32 %v1145_v0, %v1056_v60  ;;  %v1208_v6 = vadd.f32 %v1176_v61, %v1144_v1  ;;  %v1272_v7 = vmul.f32 %v1144_v1, %v1051_v62  ;;  %v1187_v60 = vld [vmem:[%s2539_s9 + $0xd8] sm:$0xff]  ;;  %v1186_v62 = vld [vmem:[%s2539_s9 + $0xd0] sm:$0xff] }
 0x289   : > { %v1066_v9 = vpop.permute.xlu1 %1065  ;;  %v1061_v11 = vpop.permute.xlu0 %1060 }
 0x28a   : > { %1241 = vst [vmem:[%s2554_s19 + $0x88] sm:$0xff] %v1209_v4  ;;  %1240 = vst [vmem:[%s2554_s19 + $0x80] sm:$0xff] %v1208_v6  ;;  %v1797_v12 = vpack.c.bf16 %v1273_v5, %v1272_v7  ;;  %v1147_v13 = vmul.f32 %v1066_v9, %v955_v2  ;;  %v1146_v14 = vmul.f32 %v1061_v11, %v954_v3  ;;  %v965_v3 = vld [vmem:[#allocation2 + $0xe8] sm:$0xff]  ;;  %v964_v4 = vld [vmem:[#allocation2 + $0xe0] sm:$0xff] }
 0x28c   : > { %1841 = vst [vmem:[%s2552_s27 + $0x40] sm:$0xff] %v1797_v12   ;;  %v1211_v17 = vadd.f32 %v1179_v8, %v1147_v13  ;;  %v1275_v18 = vmul.f32 %v1147_v13, %v1066_v9  ;;  %v1210_v19 = vadd.f32 %v1178_v10, %v1146_v14  ;;  %v1274_v20 = vmul.f32 %v1146_v14, %v1061_v11  ;;  %v1189_v9 = vld [vmem:[%s2539_s9 + $0xe8] sm:$0xff]  ;;  %v1188_v11 = vld [vmem:[%s2539_s9 + $0xe0] sm:$0xff] }
 0x28d   : > { %v1076_v22 = vpop.permute.xlu1 %1075  ;;  %v1071_v24 = vpop.permute.xlu0 %1070 }
 0x28e   : > { %1243 = vst [vmem:[%s2554_s19 + $0x98] sm:$0xff] %v1211_v17  ;;  %1242 = vst [vmem:[%s2554_s19 + $0x90] sm:$0xff] %v1210_v19  ;;  %v1802_v25 = vpack.c.bf16 %v1275_v18, %v1274_v20  ;;  %v1149_v26 = vmul.f32 %v1076_v22, %v957_v15  ;;  %v1148_v27 = vmul.f32 %v1071_v24, %v956_v16  ;;  %v967_v16 = vld [vmem:[#allocation2 + $0xf8] sm:$0xff]  ;;  %v966_v17 = vld [vmem:[#allocation2 + $0xf0] sm:$0xff] }
 0x290   : > { %1842 = vst [vmem:[%s2552_s27 + $0x48] sm:$0xff] %v1802_v25   ;;  %v1213_v30 = vadd.f32 %v1181_v21, %v1149_v26  ;;  %v1277_v31 = vmul.f32 %v1149_v26, %v1076_v22  ;;  %v1212_v32 = vadd.f32 %v1180_v23, %v1148_v27  ;;  %v1276_v33 = vmul.f32 %v1148_v27, %v1071_v24  ;;  %v1191_v22 = vld [vmem:[%s2539_s9 + $0xf8] sm:$0xff]  ;;  %v1190_v24 = vld [vmem:[%s2539_s9 + $0xf0] sm:$0xff] }
 0x291   : > { %v1086_v35 = vpop.permute.xlu1 %1085  ;;  %v1081_v37 = vpop.permute.xlu0 %1080 }
 0x292   : > { %1245 = vst [vmem:[%s2554_s19 + $0xa8] sm:$0xff] %v1213_v30  ;;  %1244 = vst [vmem:[%s2554_s19 + $0xa0] sm:$0xff] %v1212_v32  ;;  %v1807_v38 = vpack.c.bf16 %v1277_v31, %v1276_v33  ;;  %v1151_v39 = vmul.f32 %v1086_v35, %v959_v28  ;;  %v1150_v40 = vmul.f32 %v1081_v37, %v958_v29 }
 0x294   : > { %1843 = vst [vmem:[%s2552_s27 + $0x50] sm:$0xff] %v1807_v38   ;;  %v1215_v43 = vadd.f32 %v1183_v34, %v1151_v39  ;;  %v1279_v44 = vmul.f32 %v1151_v39, %v1086_v35  ;;  %v1214_v45 = vadd.f32 %v1182_v36, %v1150_v40  ;;  %v1278_v46 = vmul.f32 %v1150_v40, %v1081_v37 }
 0x295   : > { %v1096_v48 = vpop.permute.xlu1 %1095  ;;  %v1091_v50 = vpop.permute.xlu0 %1090 }
 0x296   : > { %1247 = vst [vmem:[%s2554_s19 + $0xb8] sm:$0xff] %v1215_v43  ;;  %1246 = vst [vmem:[%s2554_s19 + $0xb0] sm:$0xff] %v1214_v45  ;;  %v1812_v51 = vpack.c.bf16 %v1279_v44, %v1278_v46  ;;  %v1153_v52 = vmul.f32 %v1096_v48, %v961_v41  ;;  %v1152_v53 = vmul.f32 %v1091_v50, %v960_v42 }
 0x298   : > { %1844 = vst [vmem:[%s2552_s27 + $0x58] sm:$0xff] %v1812_v51   ;;  %v1217_v56 = vadd.f32 %v1185_v47, %v1153_v52  ;;  %v1281_v57 = vmul.f32 %v1153_v52, %v1096_v48  ;;  %v1216_v58 = vadd.f32 %v1184_v49, %v1152_v53  ;;  %v1280_v59 = vmul.f32 %v1152_v53, %v1091_v50 }
 0x299   : > { %v1106_v61 = vpop.permute.xlu1 %1105  ;;  %v1101_v63 = vpop.permute.xlu0 %1100 }
 0x29a   : > { %1249 = vst [vmem:[%s2554_s19 + $0xc8] sm:$0xff] %v1217_v56  ;;  %1248 = vst [vmem:[%s2554_s19 + $0xc0] sm:$0xff] %v1216_v58  ;;  %v1817_v0 = vpack.c.bf16 %v1281_v57, %v1280_v59  ;;  %v1155_v1 = vmul.f32 %v1106_v61, %v963_v54  ;;  %v1154_v2 = vmul.f32 %v1101_v63, %v962_v55 }
 0x29c   : > { %1845 = vst [vmem:[%s2552_s27 + $0x60] sm:$0xff] %v1817_v0   ;;  %v1219_v5 = vadd.f32 %v1187_v60, %v1155_v1  ;;  %v1283_v6 = vmul.f32 %v1155_v1, %v1106_v61  ;;  %v1218_v7 = vadd.f32 %v1186_v62, %v1154_v2  ;;  %v1282_v8 = vmul.f32 %v1154_v2, %v1101_v63 }
 0x29d   : > { %v1116_v10 = vpop.permute.xlu1 %1115  ;;  %v1111_v12 = vpop.permute.xlu0 %1110 }
 0x29e   : > { %1251 = vst [vmem:[%s2554_s19 + $0xd8] sm:$0xff] %v1219_v5  ;;  %1250 = vst [vmem:[%s2554_s19 + $0xd0] sm:$0xff] %v1218_v7  ;;  %v1822_v13 = vpack.c.bf16 %v1283_v6, %v1282_v8  ;;  %v1157_v14 = vmul.f32 %v1116_v10, %v965_v3  ;;  %v1156_v15 = vmul.f32 %v1111_v12, %v964_v4 }
 0x2a0   : > { %1846 = vst [vmem:[%s2552_s27 + $0x68] sm:$0xff] %v1822_v13   ;;  %v1221_v18 = vadd.f32 %v1189_v9, %v1157_v14  ;;  %v1285_v19 = vmul.f32 %v1157_v14, %v1116_v10  ;;  %v1220_v20 = vadd.f32 %v1188_v11, %v1156_v15  ;;  %v1284_v21 = vmul.f32 %v1156_v15, %v1111_v12 }
 0x2a1   : > { %v1126_v23 = vpop.permute.xlu1 %1125  ;;  %v1121_v25 = vpop.permute.xlu0 %1120 }
 0x2a2   : > { %1253 = vst [vmem:[%s2554_s19 + $0xe8] sm:$0xff] %v1221_v18  ;;  %1252 = vst [vmem:[%s2554_s19 + $0xe0] sm:$0xff] %v1220_v20  ;;  %v1827_v26 = vpack.c.bf16 %v1285_v19, %v1284_v21  ;;  %v1159_v27 = vmul.f32 %v1126_v23, %v967_v16  ;;  %v1158_v28 = vmul.f32 %v1121_v25, %v966_v17 }
 0x2a4   : > { %1847 = vst [vmem:[%s2552_s27 + $0x70] sm:$0xff] %v1827_v26   ;;  %v1223_v29 = vadd.f32 %v1191_v22, %v1159_v27  ;;  %v1287_v30 = vmul.f32 %v1159_v27, %v1126_v23  ;;  %v1222_v31 = vadd.f32 %v1190_v24, %v1158_v28  ;;  %v1286_v32 = vmul.f32 %v1158_v28, %v1121_v25 }
 0x2a6   : > { %1255 = vst [vmem:[%s2554_s19 + $0xf8] sm:$0xff] %v1223_v29  ;;  %1254 = vst [vmem:[%s2554_s19 + $0xf0] sm:$0xff] %v1222_v31  ;;  %v1832_v33 = vpack.c.bf16 %v1287_v30, %v1286_v32 }
 0x2a8   : > { %1848 = vst [vmem:[%s2552_s27 + $0x78] sm:$0xff] %v1832_v33  }
 0x2a9 PF: > { %s1752_s2 = sshll.u32 %s2287_s15, 11  ;;  %s1467_s24 = sshll.u32 %s2552_s27, 4  ;;  %s2727_s24 = int_to_ptr.vmem [resolvable:$true] %s1467_s24 }
 0x2aa   : > { %s2724_s14 = scalar_lea.hbm %s2825_s6, %s1752_s2  ;;  %s1449_s9 = scalar_lea.sflag [#allocation9], %s2533_s25 }
 0x2ab   : > { %s2151_s0 = scalar_lea.vmem %s2727_s24, 2048  ;;  %p2851_p10 = scmp.ne.s32.totalorder %s2845_s26, 0 }
 0x2ac   : > { %p2152_p7 = scmp.ne.s32.totalorder %s2727_s24, %s2151_s0  ;;  %s2308_s28 = smov [#allocation10]  }
 0x2ad   : > { %s2155_s16 = sshll.u32 %s2308_s28, 4  ;;  %s2156_s16 = int_to_ptr.vmem [resolvable:$false] %s2155_s16 }
 0x2ae   : > { %p2153_p12 = pnand %p2152_p7, %p2851_p10  ;;  %s2157_s20 = scalar_lea.vmem %s2156_s16, 4096 }
 0x2af   : > { %p2158_p0 = scmp.lt.s32.totalorder %s2727_s24, %s2156_s16  ;;  %p2159_p2 = scmp.lt.s32.totalorder %s2157_s20, %s2151_s0 }
 0x2b0   : > { %p2154_p13 = pneg %p2153_p12 }
 0x2b1   : > { %p2160_p4 = por %p2159_p2, %p2158_p0 }
 0x2b3   : > { %p2161_p1 = pnand %p2160_p4, %p2154_p13 }
 0x2b5   : > { %2164 = shalt.err (!%p2161_p1)
}
 0x2b6   : > { %s2165_s27 = scalar_lea.hbm %s2724_s14, 2048  ;;  %s2169_s8 = scalar_lea.hbm %s2825_s6, 4096 }
 0x2b7   : > { %p2166_p5 = scmp.ne.s32.totalorder %s2724_s14, %s2165_s27  ;;  %p2170_p9 = scmp.lt.u32.totalorder %s2724_s14, %s2825_s6 }
 0x2b8   : > { %p2171_p8 = scmp.lt.u32.totalorder %s2169_s8, %s2165_s27  ;;  %p2173_p7 = scmp.lt.u32.totalorder %s2165_s27, %s2724_s14 }
 0x2b9   : > { %p2167_p6 = pnand %p2166_p5, %p2851_p10 }
 0x2ba   : > { %p2172_p11 = por %p2171_p8, %p2170_p9 }
 0x2bb   : > { %p2168_p3 = pneg %p2167_p6 }
 0x2bc   : > { %p2174_p12 = por %p2173_p7, %p2172_p11 }
 0x2be   : > { %p2175_p13 = pnand %p2174_p12, %p2168_p3 }
 0x2c0   : > { %2178 = shalt.err (!%p2175_p13)
}
 0x2c1   : > { %s2309_s22 = smov 64   ;;  %s2310_s2 = smov 4  }
 0x2c2   : > { %1979 = dma.vmem_to_hbm [thread:$0]  (%p2851_p10), %s2727_s24, 2048, %s2724_s14, %s1449_s9, %s2309_s22, %s2309_s22, %s2310_s2  }
 0x2c3   : > { %s1753_s3 = sshll.u32 %s2287_s15, 12  ;;  %s1483_s5 = sshll.u32 %s2554_s19, 4  ;;  %s2760_s5 = int_to_ptr.vmem [resolvable:$true] %s1483_s5 }
 0x2c4   : > { %s2758_s16 = scalar_lea.hbm %s2826_s7, %s1753_s3  ;;  %s1454_s20 = scalar_lea.sflag [#allocation12], %s2533_s25 }
 0x2c5   : > { %s2179_s27 = scalar_lea.vmem %s2760_s5, 4096  ;;  %s2311_s21 = smov [#allocation11]  }
 0x2c6   : > { %p2180_p0 = scmp.ne.s32.totalorder %s2760_s5, %s2179_s27  ;;  %s2183_s14 = sshll.u32 %s2311_s21, 4  ;;  %s2184_s14 = int_to_ptr.vmem [resolvable:$false] %s2183_s14 }
 0x2c7   : > { %s2185_s15 = scalar_lea.vmem %s2184_s14, 8192  ;;  %p2186_p1 = scmp.lt.s32.totalorder %s2760_s5, %s2184_s14 }
 0x2c8   : > { %p2181_p2 = pnand %p2180_p0, %p2851_p10  ;;  %p2187_p5 = scmp.lt.s32.totalorder %s2185_s15, %s2179_s27 }
 0x2ca   : > { %p2182_p4 = pneg %p2181_p2  ;;  %p2188_p6 = por %p2187_p5, %p2186_p1 }
 0x2cc   : > { %p2189_p3 = pnand %p2188_p6, %p2182_p4 }
 0x2ce   : > { %2192 = shalt.err (!%p2189_p3)
}
 0x2cf   : > { %s2193_s19 = scalar_lea.hbm %s2758_s16, 4096  ;;  %s2197_s12 = scalar_lea.hbm %s2826_s7, 8192 }
 0x2d0   : > { %p2194_p9 = scmp.ne.s32.totalorder %s2758_s16, %s2193_s19  ;;  %p2198_p7 = scmp.lt.u32.totalorder %s2758_s16, %s2826_s7 }
 0x2d1   : > { %p2199_p12 = scmp.lt.u32.totalorder %s2197_s12, %s2193_s19  ;;  %p2201_p0 = scmp.lt.u32.totalorder %s2193_s19, %s2758_s16 }
 0x2d2   : > { %p2195_p8 = pnand %p2194_p9, %p2851_p10 }
 0x2d3   : > { %p2200_p13 = por %p2199_p12, %p2198_p7 }
 0x2d4   : > { %p2196_p11 = pneg %p2195_p8 }
 0x2d5   : > { %p2202_p2 = por %p2201_p0, %p2200_p13 }
 0x2d7   : > { %p2203_p4 = pnand %p2202_p2, %p2196_p11 }
 0x2d9   : > { %2206 = shalt.err (!%p2203_p4)
}
 0x2da   : > { %s2312_s30 = smov 128   ;;  %s2313_s22 = smov 8  }
 0x2db   : > { %1980 = dma.vmem_to_hbm [thread:$0]  (%p2851_p10), %s2760_s5, 4096, %s2758_s16, %s1454_s20, %s2312_s30, %s2312_s30, %s2313_s22  }
 0x2dc PF: > { %s2852_s2 = sld [smem:[#allocation21_spill]]  ;;  %p1990_p1 = scmp.ge.s32.totalorder %s2299_s18, 2 }
 0x2dd   : > { %s1498_s3 = sand.u32 1, %s2263_s1  }
 0x2de   : > { %s1499_s0 = scalar_lea.sflag [#allocation9], %s1498_s3 }
 0x2e2   : > { %p2853_p5 = scmp.ne.s32.totalorder %s2852_s2, 0 }
 0x2e4   : > { %p1984_p6 = pnand %p1990_p1, %p2853_p5 }
 0x2e6   : > { %2254 = dma.done.wait (!%p1984_p6), %s1499_s0, 2048  }
 0x2e7   : > { %2256 = vsyncadd (!%p1984_p6), %s1499_s0, 4294965248  ;;  %s1508_s28 = scalar_lea.sflag [#allocation12], %s1498_s3 }
 0x2e8   : > { %2258 = dma.done.wait (!%p1984_p6), %s1508_s28, 4096  }
 0x2e9   : > { %2260 = vsyncadd (!%p1984_p6), %s1508_s28, 4294963200  ;;  %s37_s18 = sadd.s32 1, %s2299_s18   ;;  %s2854_s26 = sld [smem:[#allocation20_spill]] }
 0x2ea   : > { %p34_p3 = scmp.ge.s32.totalorder %s37_s18, 6   ;;  %s2855_s14 = sld [smem:[#allocation17_spill]] }
 0x2eb   : > { %s2856_s16 = sld [smem:[#allocation18_spill]]  ;;  %s2857_s25 = sld [smem:[#allocation19_spill]] }
 0x2ec   : > { %s2858_s1 = smov %s2267_s10  ;;  %s2859_s10 = smov %s2271_s11 }
 0x2ed   : > { %s2861_s12 = smov %s2279_s13  ;;  %s2862_s13 = smov %s2467_s29 }
 0x2ee   : > { %s2863_s15 = smov %s2295_s17  ;;  %36 = sbr.rel (!%p34_p3) target bundleno = 37 (0x25), region = 145 }
 0x2ef   : > { %s2860_s11 = smov %s2854_s26 }
 0x2f1   : > { %s2864_s17 = smov %s2857_s25 }
 0x2f5   :  { %1513 = vsyncpa [#allocation8], 1 }
 0x2f6   :  { %1515 = vsyncpa [#allocation8 + $0x1], 1 }
 0x2f7   :  { %1516 = vsyncpa [#allocation9], 1 }
 0x2f8   :  { %1518 = vsyncpa [#allocation9 + $0x1], 1 }
 0x2f9   :  { %1519 = vsyncpa [#allocation12], 1 }
 0x2fa   :  { %1521 = vsyncpa [#allocation12 + $0x1], 1 }

</bundles_post_ra>
